<compile_context>
chip_gen: v7x
topology: tpu7x:2x2x1
jax: 0.10.0
libtpu: 0.0.40
codegen_flags: <defaults>
</compile_context>

<pallas_src>
import functools

import jax
import jax.numpy as jnp
from jax.experimental import pallas as pl
from jax.experimental.pallas import tpu as pltpu


def _doctor_kernel(x_ref, w1_ref, b1_ref, wfc_ref, bfc_ref, group_ref, tail_ref,
                   out_ref, acc_ref, *, weight, pred):
    """Pipelined over the D (feature/reduction) axis.

    x_ref:     (B, TK)    bf16 input tile (streamed)
    w1_ref:    (TK, H)    bf16 features-Linear weight tile (the dominant stream)
    b1_ref:    (1, H)     f32 features-Linear bias (resident)
    wfc_ref:   (H, R*K)   bf16 fc weight (resident, single fused MXU push)
    bfc_ref:   (1, R*K)   f32 fc bias (resident)
    group_ref: (R*K, R*K) f32 block-diagonal ones (per-rater softmax denominator)
    tail_ref:  (R*K, K)   f32 rater-fold matrix (pre-scaled by rater weights
                          when weight=True)                       [pred=True]
               (1, R*K)   f32 normalized rater weights, repeated K times
                          (only read when weight=True)            [pred=False]
    out_ref:   (B, R*K)   per-rater softmax slab                  [pred=False]
               (B, K)     rater-summed prediction                 [pred=True]
    acc_ref:   (B, H)     f32 matmul accumulator (persists across grid steps)
    """
    k = pl.program_id(0)

    @pl.when(k == 0)
    def _init():
        acc_ref[...] = jnp.zeros_like(acc_ref)

    # features Linear: accumulate this D-tile's contribution (bf16 MXU, f32 acc).
    acc_ref[...] += jnp.dot(x_ref[...], w1_ref[...],
                            preferred_element_type=jnp.float32)

    @pl.when(k == pl.num_programs(0) - 1)
    def _epilogue():
        h = jnp.maximum(acc_ref[...] + b1_ref[...], 0.0)          # bias + ReLU
        # TODO(synk): nn.Dropout(0.5) training-mode masking not implemented
        # (eval-mode identity only).

        # fc: single fused bf16 matmul producing lane-dense (B, R*K) logits
        # (f32 accumulation; bf16 operands avoid the multi-pass f32 MXU path).
        logits = jnp.dot(h.astype(jnp.bfloat16), wfc_ref[...],
                         preferred_element_type=jnp.float32) + bfc_ref[...]

        # Numerically-stable per-rater softmax over K, computed on the
        # lane-dense slab.  NOTE: we deliberately subtract the row-wide max
        # over all R*K logits (>= every per-rater max) — this is correct and
        # avoids extra layout work; do NOT "fix" it into a per-group max.
        m = jnp.max(logits, axis=-1, keepdims=True)
        e = jnp.exp(logits - m)                                    # (B, R*K)
        # Per-rater denominators via the host-precomputed block-diagonal ones
        # matrix (kept f32: ~50-wide, not a bottleneck; preserves accuracy).
        denom = jnp.dot(e, group_ref[...], preferred_element_type=jnp.float32)
        s = e * pl.reciprocal(denom, approx=True)                  # EUP slot

        if pred:
            # Fold raters: (B, R*K) @ (R*K, K) -> (B, K).  Rater weights (if
            # weight=True) were pre-folded into tail_ref host-side.
            out_ref[...] = jnp.dot(s, tail_ref[...],
                                   preferred_element_type=jnp.float32)
        else:
            if weight:
                s = s * tail_ref[...]
            out_ref[...] = s


def _pick_tk(D):
    """Largest power-of-two reduction tile that divides D (review: bigger tiles
    beat per-step overhead; divisor search instead of a bare 'else D')."""
    for tk in (8192, 4096, 2048, 1024, 512, 256, 128):
        if D >= tk and D % tk == 0:
            return tk
    return D


def doctor_net_forward(x_nchw, params, *, pred=False, weight=False):
    B = x_nchw.shape[0]
    x_flat = x_nchw.reshape(B, -1)                      # Flatten(start_dim=1)
    D = x_flat.shape[1]

    w1, b1 = params["w1"], params["b1"]                 # (D, H), (H,)
    wfc, bfc = params["wfc"], params["bfc"]             # (H, R*K), (R*K,)
    wraw = params["wraw"]                               # (R,)
    R, K = params["R"], params["K"]
    H = w1.shape[1]
    RK = R * K

    # Weights module output (glue).
    weights_norm = (wraw / jnp.sum(wraw)).astype(jnp.float32)
    # Rater weights broadcast to the lane-dense (1, R*K) layout used in-kernel.
    wbc = jnp.repeat(weights_norm, K).reshape(1, RK)

    # bf16 for the dominant w1 HBM stream (and matching operands); the
    # accumulator and the softmax epilogue stay in f32.
    x_bf = x_flat.astype(jnp.bfloat16)
    w1_bf = w1.astype(jnp.bfloat16)
    b1_2d = b1.reshape(1, H).astype(jnp.float32)
    wfc_bf = wfc.astype(jnp.bfloat16)
    bfc_2d = bfc.reshape(1, RK).astype(jnp.float32)

    # Host-precomputed epilogue constants (tiny, resident in VMEM).
    ridx = jnp.arange(RK) // K
    group = (ridx[:, None] == ridx[None, :]).astype(jnp.float32)   # (RK, RK)
    if pred:
        fold = (jnp.arange(RK)[:, None] % K
                == jnp.arange(K)[None, :]).astype(jnp.float32)     # (RK, K)
        if weight:
            fold = fold * wbc.reshape(RK, 1)   # pre-scale: drops in-kernel mul
        tail = fold
        tail_spec = pl.BlockSpec((RK, K), lambda k: (0, 0))
        out_shape = jax.ShapeDtypeStruct((B, K), jnp.float32)
        out_elems = B * K
    else:
        tail = wbc
        tail_spec = pl.BlockSpec((1, RK), lambda k: (0, 0))
        out_shape = jax.ShapeDtypeStruct((B, RK), jnp.float32)
        out_elems = B * RK

    # Bigger D tiles: fewer grid steps -> less fixed per-step overhead on a
    # DMA-dominated kernel.  Double-buffered bf16 w1 tiles stay ~2 MiB.
    TK = _pick_tk(D)
    grid = (max(D // TK, 1),)

    kernel = functools.partial(_doctor_kernel, weight=weight, pred=pred)

    cost = pl.CostEstimate(
        flops=(2 * B * D * H + 2 * B * H * RK + 2 * B * RK * RK
               + (2 * B * RK * K if pred else 0)),
        transcendentals=2 * B * RK,                     # exp + reciprocal
        bytes_accessed=(x_bf.size * 2 + w1_bf.size * 2 + wfc_bf.size * 2
                        + b1_2d.size * 4 + bfc_2d.size * 4
                        + group.size * 4 + tail.size * 4 + out_elems * 4),
    )

    out = pl.pallas_call(
        kernel,
        out_shape=out_shape,
        grid_spec=pltpu.PrefetchScalarGridSpec(
            num_scalar_prefetch=0,
            grid=grid,
            in_specs=[
                pl.BlockSpec((B, TK), lambda k: (0, k)),     # x tile (streamed)
                pl.BlockSpec((TK, H), lambda k: (k, 0)),     # w1 tile (streamed)
                pl.BlockSpec((1, H), lambda k: (0, 0)),      # b1 (resident)
                pl.BlockSpec((H, RK), lambda k: (0, 0)),     # wfc (resident)
                pl.BlockSpec((1, RK), lambda k: (0, 0)),     # bfc (resident)
                pl.BlockSpec((RK, RK), lambda k: (0, 0)),    # group-sum const
                tail_spec,                                   # fold / rater wts
            ],
            out_specs=pl.BlockSpec(out_shape.shape, lambda k: (0, 0)),
            scratch_shapes=[pltpu.VMEM((B, H), jnp.float32)],
        ),
        compiler_params=pltpu.CompilerParams(
            dimension_semantics=("arbitrary",)),
        cost_estimate=cost,
    )(x_bf, w1_bf, b1_2d, wfc_bf, bfc_2d, group, tail)

    if pred:
        return out
    return out.reshape(B, R, K), weights_norm


def _reference(x_nchw, params, *, pred=False, weight=False, bf16_w1=True):
    """Pure-JAX reference (PyTorch semantics; optional bf16 first matmul to
    match the kernel's streamed-weight dtype)."""
    B = x_nchw.shape[0]
    x = x_nchw.reshape(B, -1).astype(jnp.float32)
    if bf16_w1:
        h = jnp.dot(x.astype(jnp.bfloat16), params["w1"].astype(jnp.bfloat16),
                    preferred_element_type=jnp.float32)
    else:
        h = x @ params["w1"]
    h = jnp.maximum(h + params["b1"], 0.0)
    out = h @ params["wfc"] + params["bfc"]
    out = out.reshape(B, params["R"], params["K"])
    out = jax.nn.softmax(out, axis=2)
    wn = params["wraw"] / params["wraw"].sum()
    if weight:
        out = out * wn[None, :, None]
    if pred:
        return out.sum(axis=1)
    return out, wn


if __name__ == "__main__":
    # FCNN branch: Flatten -> Linear(8192, 128), so C*H*W must equal 8192.
    B, C, Himg, Wimg = 2, 8, 32, 32
    D, Hfeat = C * Himg * Wimg, 128
    R, K = 5, 10

    key = jax.random.PRNGKey(0)
    k_x, k_w1, k_b1, k_wfc, k_bfc = jax.random.split(key, 5)

    params = {
        "w1": jax.random.normal(k_w1, (D, Hfeat), jnp.float32) * 0.02,
        "b1": jax.random.normal(k_b1, (Hfeat,), jnp.float32) * 0.01,
        "wfc": jax.random.normal(k_wfc, (Hfeat, R * K), jnp.float32) * 0.05,
        "bfc": jax.random.normal(k_bfc, (R * K,), jnp.float32) * 0.01,
        "wraw": jnp.ones((R,), jnp.float32) / R,   # Weights.__init__: ones(R)/R
        "R": R,
        "K": K,
    }

    x = jax.random.normal(k_x, (B, C, Himg, Wimg), jnp.float32)

    # Path 1: pred=False, weight=False -> (x_brk, weights)
    x_brk, wts = doctor_net_forward(x, params, pred=False, weight=False)
    jax.block_until_ready(x_brk)
    ref_x, ref_w = _reference(x, params, pred=False, weight=False)
    assert jnp.allclose(x_brk, ref_x, rtol=5e-3, atol=5e-3), "pred=False mismatch"
    assert jnp.allclose(wts, ref_w, rtol=1e-6, atol=1e-7), "weights mismatch"

    # Path 2: pred=True, weight=True -> (B, K) consensus prediction
    pred_bk = doctor_net_forward(x, params, pred=True, weight=True)
    jax.block_until_ready(pred_bk)
    ref_pred = _reference(x, params, pred=True, weight=True)
    assert jnp.allclose(pred_bk, ref_pred, rtol=5e-3, atol=5e-3), "pred=True mismatch"

    print("KERNEL_OK")
</pallas_src>

<mosaic_0001>
module attributes {stable_mosaic.version = 11 : i64} {
  func.func @_doctor_kernel(%arg0: i32, %arg1: memref<2x8192xbf16, #tpu.memory_space<vmem>>, %arg2: memref<8192x128xbf16, #tpu.memory_space<vmem>>, %arg3: memref<1x128xf32, #tpu.memory_space<vmem>>, %arg4: memref<128x50xbf16, #tpu.memory_space<vmem>>, %arg5: memref<1x50xf32, #tpu.memory_space<vmem>>, %arg6: memref<50x50xf32, #tpu.memory_space<vmem>>, %arg7: memref<1x50xf32, #tpu.memory_space<vmem>>, %arg8: memref<2x50xf32, #tpu.memory_space<vmem>>, %arg9: memref<2x128xf32, #tpu.memory_space<vmem>>) attributes {dimension_semantics = [#tpu.dimension_semantics<arbitrary>], iteration_bounds = array<i64: 1>, scalar_prefetch = 0 : i64, scratch_operands = 1 : i64, tpu.core_type = #tpu.core_type<tc>, window_params = [{transform_indices = @transform_0, window_bounds = array<i64: 2, 8192>}, {transform_indices = @transform_1, window_bounds = array<i64: 8192, 128>}, {pipeline_mode = #tpu.pipeline_mode<synchronous>, transform_indices = @transform_2, window_bounds = array<i64: 1, 128>}, {pipeline_mode = #tpu.pipeline_mode<synchronous>, transform_indices = @transform_3, window_bounds = array<i64: 128, 50>}, {pipeline_mode = #tpu.pipeline_mode<synchronous>, transform_indices = @transform_4, window_bounds = array<i64: 1, 50>}, {pipeline_mode = #tpu.pipeline_mode<synchronous>, transform_indices = @transform_5, window_bounds = array<i64: 50, 50>}, {pipeline_mode = #tpu.pipeline_mode<synchronous>, transform_indices = @transform_6, window_bounds = array<i64: 1, 50>}, {pipeline_mode = #tpu.pipeline_mode<synchronous>, transform_indices = @transform_7, window_bounds = array<i64: 2, 50>}]} {
    %c0_i32 = arith.constant 0 : i32
    %0 = arith.cmpi eq, %arg0, %c0_i32 : i32
    %1 = arith.extui %0 : i1 to i32
    %c0_i32_0 = arith.constant 0 : i32
    %2 = arith.cmpi ne, %1, %c0_i32_0 : i32
    scf.if %2 {
      %cst_10 = arith.constant 0.000000e+00 : f32
      %12 = vector.broadcast %cst_10 : f32 to vector<2x128xf32>
      %c0_11 = arith.constant 0 : index
      %c0_12 = arith.constant 0 : index
      %13 = vector.load %arg9[%c0_11, %c0_12] : memref<2x128xf32, #tpu.memory_space<vmem>>, vector<2x128xf32>
      tpu.vector_store %arg9[%c0_11, %c0_12], %12 {strides = array<i32>} : memref<2x128xf32, #tpu.memory_space<vmem>>, vector<2x128xf32>,
    } else {
    }
    %c0 = arith.constant 0 : index
    %c0_1 = arith.constant 0 : index
    %3 = vector.load %arg9[%c0, %c0_1] : memref<2x128xf32, #tpu.memory_space<vmem>>, vector<2x128xf32>
    %c0_2 = arith.constant 0 : index
    %c0_3 = arith.constant 0 : index
    %4 = vector.load %arg1[%c0_2, %c0_3] : memref<2x8192xbf16, #tpu.memory_space<vmem>>, vector<2x8192xbf16>
    %c0_4 = arith.constant 0 : index
    %c0_5 = arith.constant 0 : index
    %5 = vector.load %arg2[%c0_4, %c0_5] : memref<8192x128xbf16, #tpu.memory_space<vmem>>, vector<8192x128xbf16>
    %cst = arith.constant dense<0.000000e+00> : vector<2x128xf32>
    %6 = tpu.matmul %4, %5, %cst {dimension_numbers = #tpu.dot_dimension_numbers<[1], [0], [0], [1], [0, 0, 1, 1], [], []>} : vector<2x8192xbf16>, vector<8192x128xbf16>, vector<2x128xf32> -> vector<2x128xf32>
    %7 = arith.addf %3, %6 : vector<2x128xf32>
    %c0_6 = arith.constant 0 : index
    %c0_7 = arith.constant 0 : index
    %8 = vector.load %arg9[%c0_6, %c0_7] : memref<2x128xf32, #tpu.memory_space<vmem>>, vector<2x128xf32>
    tpu.vector_store %arg9[%c0_6, %c0_7], %7 {strides = array<i32>} : memref<2x128xf32, #tpu.memory_space<vmem>>, vector<2x128xf32>,
    %c0_i32_8 = arith.constant 0 : i32
    %9 = arith.cmpi eq, %arg0, %c0_i32_8 : i32
    %10 = arith.extui %9 : i1 to i32
    %c0_i32_9 = arith.constant 0 : i32
    %11 = arith.cmpi ne, %10, %c0_i32_9 : i32
    scf.if %11 {
      %c0_10 = arith.constant 0 : index
      %c0_11 = arith.constant 0 : index
      %12 = vector.load %arg9[%c0_10, %c0_11] : memref<2x128xf32, #tpu.memory_space<vmem>>, vector<2x128xf32>
      %c0_12 = arith.constant 0 : index
      %c0_13 = arith.constant 0 : index
      %13 = vector.load %arg3[%c0_12, %c0_13] : memref<1x128xf32, #tpu.memory_space<vmem>>, vector<1x128xf32>
      %14 = vector.broadcast %13 : vector<1x128xf32> to vector<2x128xf32>
      %15 = arith.addf %12, %14 : vector<2x128xf32>
      %cst_14 = arith.constant 0.000000e+00 : f32
      %16 = vector.broadcast %cst_14 : f32 to vector<2x128xf32>
      %17 = arith.maximumf %15, %16 : vector<2x128xf32>
      %18 = arith.truncf %17 : vector<2x128xf32> to vector<2x128xbf16>
      %c0_15 = arith.constant 0 : index
      %c0_16 = arith.constant 0 : index
      %19 = vector.load %arg4[%c0_15, %c0_16] : memref<128x50xbf16, #tpu.memory_space<vmem>>, vector<128x50xbf16>
      %cst_17 = arith.constant dense<0.000000e+00> : vector<2x50xf32>
      %20 = tpu.matmul %18, %19, %cst_17 {dimension_numbers = #tpu.dot_dimension_numbers<[1], [0], [0], [1], [0, 0, 1, 1], [], []>} : vector<2x128xbf16>, vector<128x50xbf16>, vector<2x50xf32> -> vector<2x50xf32>
      %c0_18 = arith.constant 0 : index
      %c0_19 = arith.constant 0 : index
      %21 = vector.load %arg5[%c0_18, %c0_19] : memref<1x50xf32, #tpu.memory_space<vmem>>, vector<1x50xf32>
      %22 = vector.broadcast %21 : vector<1x50xf32> to vector<2x50xf32>
      %23 = arith.addf %20, %22 : vector<2x50xf32>
      %cst_20 = arith.constant dense<0xFF800000> : vector<2xf32>
      %24 = vector.multi_reduction <maximumf>, %23, %cst_20 [1] : vector<2x50xf32> to vector<2xf32>
      %25 = vector.shape_cast %24 : vector<2xf32> to vector<2x1xf32>
      %26 = vector.broadcast %25 : vector<2x1xf32> to vector<2x50xf32>
      %27 = arith.subf %23, %26 : vector<2x50xf32>
      %28 = math.exp %27 : vector<2x50xf32>
      %c0_21 = arith.constant 0 : index
      %c0_22 = arith.constant 0 : index
      %29 = vector.load %arg6[%c0_21, %c0_22] : memref<50x50xf32, #tpu.memory_space<vmem>>, vector<50x50xf32>
      %cst_23 = arith.constant dense<0.000000e+00> : vector<2x50xf32>
      %30 = tpu.matmul %28, %29, %cst_23 {dimension_numbers = #tpu.dot_dimension_numbers<[1], [0], [0], [1], [0, 0, 1, 1], [], []>} : vector<2x50xf32>, vector<50x50xf32>, vector<2x50xf32> -> vector<2x50xf32>
      %31 = tpu.reciprocal %30 {approx = true} : vector<2x50xf32> -> vector<2x50xf32>
      %32 = arith.mulf %28, %31 : vector<2x50xf32>
      %c0_24 = arith.constant 0 : index
      %c0_25 = arith.constant 0 : index
      %33 = vector.load %arg8[%c0_24, %c0_25] : memref<2x50xf32, #tpu.memory_space<vmem>>, vector<2x50xf32>
      tpu.vector_store %arg8[%c0_24, %c0_25], %32 {strides = array<i32>} : memref<2x50xf32, #tpu.memory_space<vmem>>, vector<2x50xf32>,
    } else {
    }
    return
  }
  func.func @transform_0(%arg0: i32) -> (i32, i32) {
    %c0_i32 = arith.constant 0 : i32
    %c0_i32_0 = arith.constant 0 : i32
    return %c0_i32, %arg0 : i32, i32
  }
  func.func @transform_1(%arg0: i32) -> (i32, i32) {
    %c0_i32 = arith.constant 0 : i32
    %c0_i32_0 = arith.constant 0 : i32
    return %arg0, %c0_i32 : i32, i32
  }
  func.func @transform_2(%arg0: i32) -> (i32, i32) {
    %c0_i32 = arith.constant 0 : i32
    %c0_i32_0 = arith.constant 0 : i32
    %c0_i32_1 = arith.constant 0 : i32
    return %c0_i32, %c0_i32_0 : i32, i32
  }
  func.func @transform_3(%arg0: i32) -> (i32, i32) {
    %c0_i32 = arith.constant 0 : i32
    %c0_i32_0 = arith.constant 0 : i32
    %c0_i32_1 = arith.constant 0 : i32
    return %c0_i32, %c0_i32_0 : i32, i32
  }
  func.func @transform_4(%arg0: i32) -> (i32, i32) {
    %c0_i32 = arith.constant 0 : i32
    %c0_i32_0 = arith.constant 0 : i32
    %c0_i32_1 = arith.constant 0 : i32
    return %c0_i32, %c0_i32_0 : i32, i32
  }
  func.func @transform_5(%arg0: i32) -> (i32, i32) {
    %c0_i32 = arith.constant 0 : i32
    %c0_i32_0 = arith.constant 0 : i32
    %c0_i32_1 = arith.constant 0 : i32
    return %c0_i32, %c0_i32_0 : i32, i32
  }
  func.func @transform_6(%arg0: i32) -> (i32, i32) {
    %c0_i32 = arith.constant 0 : i32
    %c0_i32_0 = arith.constant 0 : i32
    %c0_i32_1 = arith.constant 0 : i32
    return %c0_i32, %c0_i32_0 : i32, i32
  }
  func.func @transform_7(%arg0: i32) -> (i32, i32) {
    %c0_i32 = arith.constant 0 : i32
    %c0_i32_0 = arith.constant 0 : i32
    %c0_i32_1 = arith.constant 0 : i32
    return %c0_i32, %c0_i32_0 : i32, i32
  }
}

</mosaic_0001>

<bundles_post_ra>
// kernel: tpu_custom_call.1
= control target key start
LH: loop header
LB: loop body
LE: loop exit
PB: predicated region body
PF: predicated region fallthrough
CT: control target
= control target key end

     0   :  { %12 = vsyncpa [#allocation4], 0  ;;  %s8489_s0 = inlined_call_operand.hbm [shape: bf16[2,8192], index: 0, kind: input, shape index: {}]   ;;  %s8490_s1 = inlined_call_operand.hbm [shape: bf16[8192,128], index: 1, kind: input, shape index: {}]   ;;  %s8491_s2 = inlined_call_operand.hbm [shape: f32[1,128], index: 2, kind: input, shape index: {}]   ;;  %s8492_s3 = inlined_call_operand.vmem [shape: bf16[128,50], index: 3, kind: input, shape index: {}]   ;;  %s8493_s4 = inlined_call_operand.hbm [shape: f32[1,50], index: 4, kind: input, shape index: {}]   ;;  %s8494_s5 = inlined_call_operand.hbm [shape: f32[50,50], index: 5, kind: input, shape index: {}]   ;;  %s8495_s6 = inlined_call_operand.hbm [shape: f32[1,50], index: 6, kind: input, shape index: {}]   ;;  %s8496_s7 = inlined_call_operand.hbm [shape: f32[2,50], index: 7, kind: output, shape index: {}]  }
   0x1   :  { %13 = vsyncpa [#allocation7], 0 }
   0x2   :  { %14 = vsyncpa [#allocation10], 0 }
   0x3   :  { %15 = vsyncpa [#allocation13], 0 }
   0x4   :  { %16 = vsyncpa [#allocation5], 0  ;;  %s8198_s24 = smov [#allocation6]   ;;  %s8034_s28 = scalar_lea.hbm %s8490_s1, 65536 }
   0x5   :  { %s32_s25 = sshll.u32 %s8198_s24, 4  ;;  %p8035_p0 = scmp.ne.s32.totalorder %s8490_s1, %s8034_s28  ;;  %s33_s25 = int_to_ptr.vmem [resolvable:$true] %s32_s25 }
   0x6   :  { %p8038_p1 = scmp.lt.u32.totalorder %s8034_s28, %s8490_s1 }
   0x8   :  { %p8040_p2 = pnand %p8038_p1, %p8035_p0 }
   0xa   :  { %8043 = shalt.err (!%p8040_p2)
}
   0xb   :  { %s8044_s10 = scalar_lea.vmem %s33_s25, 65536  ;;  %p8049_p4 = scmp.lt.s32.totalorder %s33_s25, %s33_s25 }
   0xc   :  { %p8045_p3 = scmp.ne.s32.totalorder %s33_s25, %s8044_s10  ;;  %p8050_p5 = scmp.lt.s32.totalorder %s8044_s10, %s8044_s10 }
   0xe   :  { %p8051_p6 = por %p8050_p5, %p8049_p4 }
  0x10   :  { %p8052_p7 = pnand %p8051_p6, %p8045_p3 }
  0x12   :  { %8055 = shalt.err (!%p8052_p7)
}
  0x13   :  { %s8199_s11 = smov 64   ;;  %s8200_s12 = smov 4  }
  0x14   :  { %38 = dma.hbm_to_vmem [thread:$0]  %s8490_s1, 65536, %s33_s25, [#allocation7], %s8199_s11, %s8199_s11, %s8200_s12  }
  0x15   :  { %s8201_s15 = smov [#allocation9]   ;;  %s8202_s17 = smov [#allocation3]  }
  0x16   :  { %s57_s16 = sshll.u32 %s8201_s15, 4  ;;  %s23_s18 = sshll.u32 %s8202_s17, 4  ;;  %s58_s16 = int_to_ptr.vmem [resolvable:$true] %s57_s16  ;;  %s24_s18 = int_to_ptr.vmem [resolvable:$true] %s23_s18 }
  0x17   :  { %s8056_s21 = scalar_lea.hbm %s8493_s4, 16 }
  0x18   :  { %p8057_p8 = scmp.ne.s32.totalorder %s8493_s4, %s8056_s21  ;;  %p8060_p9 = scmp.lt.u32.totalorder %s8056_s21, %s8493_s4 }
  0x1a   :  { %p8062_p10 = pnand %p8060_p9, %p8057_p8 }
  0x1c   :  { %8065 = shalt.err (!%p8062_p10)
}
  0x1d   :  { %s8066_s1 = scalar_lea.vmem %s58_s16, 16  ;;  %s8070_s25 = scalar_lea.vmem %s58_s16, 32 }
  0x1e   :  { %p8067_p11 = scmp.ne.s32.totalorder %s58_s16, %s8066_s1  ;;  %p8071_p12 = scmp.lt.s32.totalorder %s58_s16, %s58_s16 }
  0x1f   :  { %p8072_p13 = scmp.lt.s32.totalorder %s8070_s25, %s8066_s1 }
  0x21   :  { %p8073_p0 = por %p8072_p13, %p8071_p12 }
  0x23   :  { %p8074_p1 = pnand %p8073_p0, %p8067_p11 }
  0x25   :  { %8077 = shalt.err (!%p8074_p1)
}
  0x26   :  { %60 = dma.hbm_to_vmem [thread:$0]  %s8493_s4, 16, %s58_s16, [#allocation10]  }
  0x27   :  { %s8078_s8 = scalar_lea.hbm %s8489_s0, 1024 }
  0x28   :  { %p8079_p2 = scmp.ne.s32.totalorder %s8489_s0, %s8078_s8  ;;  %p8082_p3 = scmp.lt.u32.totalorder %s8078_s8, %s8489_s0 }
  0x2a   :  { %p8084_p4 = pnand %p8082_p3, %p8079_p2 }
  0x2c   :  { %8087 = shalt.err (!%p8084_p4)
}
  0x2d   :  { %s8088_s13 = scalar_lea.vmem %s24_s18, 1024  ;;  %p8093_p6 = scmp.lt.s32.totalorder %s24_s18, %s24_s18 }
  0x2e   :  { %p8089_p5 = scmp.ne.s32.totalorder %s24_s18, %s8088_s13  ;;  %p8094_p7 = scmp.lt.s32.totalorder %s8088_s13, %s8088_s13 }
  0x30   :  { %p8095_p8 = por %p8094_p7, %p8093_p6 }
  0x32   :  { %p8096_p9 = pnand %p8095_p8, %p8089_p5 }
  0x34   :  { %8099 = shalt.err (!%p8096_p9)
}
  0x35   :  { %26 = dma.hbm_to_vmem [thread:$0]  %s8489_s0, 1024, %s24_s18, [#allocation4]  }
  0x36   :  { %s8203_s15 = smov [#allocation8]   ;;  %s8204_s17 = smov [#allocation11]  }
  0x37   :  { %s45_s16 = sshll.u32 %s8203_s15, 4  ;;  %s66_s19 = sshll.u32 %s8204_s17, 4  ;;  %s46_s16 = int_to_ptr.vmem [resolvable:$true] %s45_s16  ;;  %s67_s19 = int_to_ptr.vmem [resolvable:$true] %s66_s19 }
  0x38   :  { %s8100_s22 = scalar_lea.hbm %s8491_s2, 16 }
  0x39   :  { %p8101_p10 = scmp.ne.s32.totalorder %s8491_s2, %s8100_s22  ;;  %p8104_p11 = scmp.lt.u32.totalorder %s8100_s22, %s8491_s2 }
  0x3b   :  { %p8106_p12 = pnand %p8104_p11, %p8101_p10 }
  0x3d   :  { %8109 = shalt.err (!%p8106_p12)
}
  0x3e   :  { %s8110_s0 = scalar_lea.vmem %s46_s16, 16  ;;  %s8114_s18 = scalar_lea.vmem %s46_s16, 32 }
  0x3f   :  { %p8111_p13 = scmp.ne.s32.totalorder %s46_s16, %s8110_s0  ;;  %p8115_p0 = scmp.lt.s32.totalorder %s46_s16, %s46_s16 }
  0x40   :  { %p8116_p1 = scmp.lt.s32.totalorder %s8114_s18, %s8110_s0 }
  0x42   :  { %p8117_p2 = por %p8116_p1, %p8115_p0 }
  0x44   :  { %p8118_p3 = pnand %p8117_p2, %p8111_p13 }
  0x46   :  { %8121 = shalt.err (!%p8118_p3)
}
  0x47   :  { %48 = dma.hbm_to_vmem [thread:$0]  %s8491_s2, 16, %s46_s16, [#allocation7]  }
  0x48   :  { %s8122_s30 = scalar_lea.hbm %s8494_s5, 896 }
  0x49   :  { %p8123_p4 = scmp.ne.s32.totalorder %s8494_s5, %s8122_s30  ;;  %p8126_p5 = scmp.lt.u32.totalorder %s8122_s30, %s8494_s5 }
  0x4b   :  { %p8128_p6 = pnand %p8126_p5, %p8123_p4 }
  0x4d   :  { %8131 = shalt.err (!%p8128_p6)
}
  0x4e   :  { %s8132_s12 = scalar_lea.vmem %s67_s19, 896  ;;  %p8137_p8 = scmp.lt.s32.totalorder %s67_s19, %s67_s19 }
  0x4f   :  { %p8133_p7 = scmp.ne.s32.totalorder %s67_s19, %s8132_s12  ;;  %p8138_p9 = scmp.lt.s32.totalorder %s8132_s12, %s8132_s12 }
  0x51   :  { %p8139_p10 = por %p8138_p9, %p8137_p8 }
  0x53   :  { %p8140_p11 = pnand %p8139_p10, %p8133_p7 }
  0x55   :  { %8143 = shalt.err (!%p8140_p11)
}
  0x56   :  { %s8205_s2 = smov 128   ;;  %s8206_s13 = smov 8  }
  0x57   :  { %72 = dma.hbm_to_vmem [thread:$0]  %s8494_s5, 896, %s67_s19, [#allocation10], %s8205_s2, %s8205_s2, %s8206_s13  }
  0x58   :  { %s8207_s15 = smov [#allocation12]   ;;  %s8144_s21 = scalar_lea.hbm %s8495_s6, 16 }
  0x59   :  { %s79_s16 = sshll.u32 %s8207_s15, 4  ;;  %p8145_p12 = scmp.ne.s32.totalorder %s8495_s6, %s8144_s21  ;;  %s80_s16 = int_to_ptr.vmem [resolvable:$true] %s79_s16 }
  0x5a   :  { %p8148_p13 = scmp.lt.u32.totalorder %s8144_s21, %s8495_s6 }
  0x5c   :  { %p8150_p0 = pnand %p8148_p13, %p8145_p12 }
  0x5e   :  { %8153 = shalt.err (!%p8150_p0)
}
  0x5f   :  { %s8154_s1 = scalar_lea.vmem %s80_s16, 16  ;;  %s8158_s5 = scalar_lea.vmem %s80_s16, 32 }
  0x60   :  { %p8155_p1 = scmp.ne.s32.totalorder %s80_s16, %s8154_s1  ;;  %p8159_p2 = scmp.lt.s32.totalorder %s80_s16, %s80_s16 }
  0x61   :  { %p8160_p3 = scmp.lt.s32.totalorder %s8158_s5, %s8154_s1 }
  0x63   :  { %p8161_p4 = por %p8160_p3, %p8159_p2 }
  0x65   :  { %p8162_p5 = pnand %p8161_p4, %p8155_p1 }
  0x67   :  { %8165 = shalt.err (!%p8162_p5)
}
  0x68   :  { %82 = dma.hbm_to_vmem [thread:$0]  %s8495_s6, 16, %s80_s16, [#allocation13]  }
  0x69   :  { %8188 = dma.done.wait [#allocation4], 1024  }
  0x6a   :  { %8189 = vsyncadd [#allocation4], 4294966272 }
  0x6b   :  { %8190 = dma.done.wait [#allocation7], 65552  }
  0x6c   :  { %8191 = vsyncadd [#allocation7], 4294901744 }
  0x6d   :  { %8192 = dma.done.wait [#allocation10], 912  }
  0x6e   :  { %8193 = vsyncadd [#allocation10], 4294966384 }
  0x6f   :  { %8194 = dma.done.wait [#allocation13], 16  }
  0x70   :  { %8195 = vsyncadd [#allocation13], 4294967280  ;;  %v7502_v0 = vld [vmem:[#allocation6 + $0x40] sm:$0xff]   ;;  %v7506_v4 = vld [vmem:[#allocation6 + $0x48] sm:$0xff]   ;;  %v8208_v22 = vmov 1966171168   ;;  %v1152_v24 = vlaneseq }
  0x71   :  { %v7503_v1 = vld [vmem:[#allocation6 + $0xc0] sm:$0xff]   ;;  %6720 = vmatprep.subr.bf16.mxu0 %v7502_v0  ;;  %v7507_v5 = vld [vmem:[#allocation6 + $0xc8] sm:$0xff]   ;;  %v7510_v8 = vld [vmem:[#allocation6 + $0x50] sm:$0xff]   ;;  %v1150_v23 = vunpack.c.l.s4 %v8208_v22  ;;  %vm8210_vm0 = vmmov 0   ;;  %vm6083_vm1 = vcmask 402432   ;;  %vm6101_vm2 = vcmask 1041408  }
  0x72   :  { %v7504_v2 = vld [vmem:[#allocation6] sm:$0xff]   ;;  %6742 = vmatprep.subr.bf16.mxu1 %v7503_v1  ;;  %v7508_v6 = vld [vmem:[#allocation6 + $0x8] sm:$0xff]   ;;  %v7511_v9 = vld [vmem:[#allocation6 + $0xd0] sm:$0xff]   ;;  %v1153_v30 = vshrl.u32 %v1152_v24, 7  ;;  %vm6097_vm3 = vcmask 408576  }
  0x73   :  { %v7505_v3 = vld [vmem:[#allocation6 + $0x80] sm:$0xff]   ;;  %6721 = vmatpush3.bf16.msra.mxu0 %v7504_v2  ;;  %v7509_v7 = vld [vmem:[#allocation6 + $0x88] sm:$0xff]   ;;  %v7512_v10 = vld [vmem:[#allocation6 + $0x10] sm:$0xff]   ;;  %v1151_v29 = vunpack.c.0.s8 %v1150_v23 }
  0x74   :  { %6743 = vmatpush3.bf16.msra.mxu1 %v7505_v3  ;;  %6722 = vmatprep.subr.bf16.mxu0 %v7506_v4  ;;  %v7513_v11 = vld [vmem:[#allocation6 + $0x90] sm:$0xff]   ;;  %v7514_v12 = vld [vmem:[#allocation6 + $0x58] sm:$0xff]   ;;  %v7518_v16 = vld [vmem:[#allocation6 + $0x60] sm:$0xff]  }
  0x75   :  { %6744 = vmatprep.subr.bf16.mxu1 %v7507_v5  ;;  %v7515_v13 = vld [vmem:[#allocation6 + $0xd8] sm:$0xff]   ;;  %v7519_v17 = vld [vmem:[#allocation6 + $0xe0] sm:$0xff]   ;;  %v7522_v20 = vld [vmem:[#allocation6 + $0x68] sm:$0xff]   ;;  %v8325_v35 = vsub.s32 %v1151_v29, %v1153_v30 }
  0x76   :  { %v7516_v14 = vld [vmem:[#allocation6 + $0x18] sm:$0xff]   ;;  %v7520_v18 = vld [vmem:[#allocation6 + $0x20] sm:$0xff]   ;;  %v7523_v21 = vld [vmem:[#allocation6 + $0xe8] sm:$0xff]  }
  0x77   :  { %6723 = vmatpush3.bf16.msra.mxu0 %v7508_v6  ;;  %v7517_v15 = vld [vmem:[#allocation6 + $0x98] sm:$0xff]   ;;  %v7521_v19 = vld [vmem:[#allocation6 + $0xa0] sm:$0xff]   ;;  %v7524_v25 = vld [vmem:[#allocation6 + $0x28] sm:$0xff]  }
  0x78   :  { %6745 = vmatpush3.bf16.msra.mxu1 %v7509_v7  ;;  %6724 = vmatprep.subr.bf16.mxu0 %v7510_v8  ;;  %v7525_v26 = vld [vmem:[#allocation6 + $0xa8] sm:$0xff]   ;;  %v7526_v27 = vld [vmem:[#allocation6 + $0x70] sm:$0xff]   ;;  %v7530_v33 = vld [vmem:[#allocation6 + $0x78] sm:$0xff]  }
  0x79   :  { %6746 = vmatprep.subr.bf16.mxu1 %v7511_v9  ;;  %v7527_v28 = vld [vmem:[#allocation6 + $0xf0] sm:$0xff]   ;;  %v7531_v34 = vld [vmem:[#allocation6 + $0xf8] sm:$0xff]   ;;  %v108_v38 = vld [vmem:[#allocation3] sm:$0xff] }
  0x7a   :  { %v7528_v31 = vld [vmem:[#allocation6 + $0x30] sm:$0xff]   ;;  %v7532_v36 = vld [vmem:[#allocation6 + $0x38] sm:$0xff]   ;;  %v1148_v39 = vcombine.high %v108_v38, %v108_v38  ;;  %v1155_v40 = vrot.slane %v108_v38, %v8325_v35  ;;  %v7535_v41 = vld [vmem:[#allocation6 + $0x140] sm:$0xff]  }
  0x7b   :  { %6725 = vmatpush3.bf16.msra.mxu0 %v7512_v10  ;;  %v7529_v32 = vld [vmem:[#allocation6 + $0xb0] sm:$0xff]   ;;  %v7533_v37 = vld [vmem:[#allocation6 + $0xb8] sm:$0xff]   ;;  %v7536_v42 = vld [vmem:[#allocation6 + $0x1c0] sm:$0xff]  }
  0x7c   :  { %6747 = vmatpush3.bf16.msra.mxu1 %v7513_v11  ;;  %6726 = vmatprep.subr.bf16.mxu0 %v7514_v12  ;;  %v1163_v43 = vcombine.high %v1155_v40, %v1155_v40  ;;  %v1171_v44 = vrot.slane %v1155_v40, %v8325_v35  ;;  %v8330_v45 = vrot.slane %v1148_v39, %v8325_v35  ;;  %v7537_v46 = vld [vmem:[#allocation6 + $0x100] sm:$0xff]   ;;  %v7539_v51 = vld [vmem:[#allocation6 + $0x148] sm:$0xff]   ;;  %v7543_v58 = vld [vmem:[#allocation6 + $0x150] sm:$0xff]  }
  0x7d   :  { %6748 = vmatprep.subr.bf16.mxu1 %v7515_v13  ;;  %v7538_v48 = vld [vmem:[#allocation6 + $0x180] sm:$0xff]   ;;  %v7540_v53 = vld [vmem:[#allocation6 + $0x1c8] sm:$0xff]   ;;  %v7544_v59 = vld [vmem:[#allocation6 + $0x1d0] sm:$0xff]  }
  0x7e   :  { %v1185_v47 = vrot.slane %v1163_v43, %v8325_v35  ;;  %v1164_v49 = vcombine.high %v8330_v45, %v8330_v45  ;;  %v1193_v50 = vcombine.high %v1171_v44, %v1171_v44  ;;  %v7541_v55 = vld [vmem:[#allocation6 + $0x108] sm:$0xff]   ;;  %v7545_v60 = vld [vmem:[#allocation6 + $0x110] sm:$0xff]   ;;  %v7547_v62 = vld [vmem:[#allocation6 + $0x158] sm:$0xff]  }
  0x7f   :  { %6727 = vmatpush3.bf16.msra.mxu0 %v7516_v14  ;;  %v7542_v56 = vld [vmem:[#allocation6 + $0x188] sm:$0xff]   ;;  %v7546_v61 = vld [vmem:[#allocation6 + $0x190] sm:$0xff]   ;;  %v7548_v63 = vld [vmem:[#allocation6 + $0x1d8] sm:$0xff]  }
  0x80   :  { %6749 = vmatpush3.bf16.msra.mxu1 %v7517_v15  ;;  %6728 = vmatprep.subr.bf16.mxu0 %v7518_v16  ;;  %v1195_v52 = vcombine.high %v1185_v47, %v1185_v47  ;;  %v1192_v54 = vrot.slane %v1164_v49, %v8325_v35  ;;  %v7549_v0 = vld [vmem:[#allocation6 + $0x118] sm:$0xff]   ;;  %v7551_v2 = vld [vmem:[#allocation6 + $0x160] sm:$0xff]   ;;  %v7555_v6 = vld [vmem:[#allocation6 + $0x168] sm:$0xff]  }
  0x81   :  { %6750 = vmatprep.subr.bf16.mxu1 %v7519_v17  ;;  %4708 = vmatprep.mubr.bf16.mxu0 %v1185_v47  ;;  %v7550_v1 = vld [vmem:[#allocation6 + $0x198] sm:$0xff]   ;;  %v7552_v3 = vld [vmem:[#allocation6 + $0x1e0] sm:$0xff]   ;;  %v7556_v7 = vld [vmem:[#allocation6 + $0x1e8] sm:$0xff]  }
  0x82   :  { %4748 = vmatprep.mubr.bf16.mxu1 %v1195_v52  ;;  %v1196_v57 = vcombine.high %v1192_v54, %v1192_v54  ;;  %v7553_v4 = vld [vmem:[#allocation6 + $0x120] sm:$0xff]   ;;  %v7557_v8 = vld [vmem:[#allocation6 + $0x128] sm:$0xff]   ;;  %v7559_v10 = vld [vmem:[#allocation6 + $0x170] sm:$0xff]  }
  0x83   :  { %6729 = vmatpush3.bf16.msra.mxu0 %v7520_v18  ;;  %v7554_v5 = vld [vmem:[#allocation6 + $0x1a0] sm:$0xff]   ;;  %v7558_v9 = vld [vmem:[#allocation6 + $0x1a8] sm:$0xff]   ;;  %v7560_v11 = vld [vmem:[#allocation6 + $0x1f0] sm:$0xff]   ;;  %v1178_v18 = vrot.slane %v8330_v45, %v8325_v35 }
  0x84   :  { %6751 = vmatpush3.bf16.msra.mxu1 %v7521_v19  ;;  %6730 = vmatprep.subr.bf16.mxu0 %v7522_v20  ;;  %v7561_v12 = vld [vmem:[#allocation6 + $0x130] sm:$0xff]   ;;  %v7563_v14 = vld [vmem:[#allocation6 + $0x178] sm:$0xff]   ;;  %v7567_v19 = vld [vmem:[#allocation6 + $0x240] sm:$0xff]  }
  0x85   :  { %6752 = vmatprep.subr.bf16.mxu1 %v7523_v21  ;;  %v7562_v13 = vld [vmem:[#allocation6 + $0x1b0] sm:$0xff]   ;;  %v7564_v15 = vld [vmem:[#allocation6 + $0x1f8] sm:$0xff]   ;;  %v7568_v20 = vld [vmem:[#allocation6 + $0x2c0] sm:$0xff]   ;;  %v1194_v23 = vcombine.high %v1178_v18, %v1178_v18 }
  0x86   :  { %v7565_v16 = vld [vmem:[#allocation6 + $0x138] sm:$0xff]   ;;  %v7569_v21 = vld [vmem:[#allocation6 + $0x200] sm:$0xff]   ;;  %v7571_v24 = vld [vmem:[#allocation6 + $0x248] sm:$0xff]  }
  0x87   :  { %6731 = vmatpush3.bf16.msra.mxu0 %v7524_v25  ;;  %v7566_v17 = vld [vmem:[#allocation6 + $0x1b8] sm:$0xff]   ;;  %v7570_v22 = vld [vmem:[#allocation6 + $0x280] sm:$0xff]   ;;  %v7572_v25 = vld [vmem:[#allocation6 + $0x2c8] sm:$0xff]  }
  0x88   :  { %6753 = vmatpush3.bf16.msra.mxu1 %v7525_v26  ;;  %6732 = vmatprep.subr.bf16.mxu0 %v7526_v27  ;;  %v7573_v26 = vld [vmem:[#allocation6 + $0x208] sm:$0xff]   ;;  %v7576_v29 = vld [vmem:[#allocation6 + $0x2d0] sm:$0xff]   ;;  %v7584_v38 = vld [vmem:[#allocation6 + $0x2e0] sm:$0xff]  }
  0x89   :  { %6754 = vmatprep.subr.bf16.mxu1 %v7527_v28  ;;  %v7574_v27 = vld [vmem:[#allocation6 + $0x288] sm:$0xff]   ;;  %v7575_v28 = vld [vmem:[#allocation6 + $0x250] sm:$0xff]   ;;  %v7585_v39 = vld [vmem:[#allocation6 + $0x220] sm:$0xff]  }
  0x8a   :  { %v7577_v30 = vld [vmem:[#allocation6 + $0x210] sm:$0xff]   ;;  %v7586_v40 = vld [vmem:[#allocation6 + $0x2a0] sm:$0xff]   ;;  %v7589_v43 = vld [vmem:[#allocation6 + $0x228] sm:$0xff]  }
  0x8b   :  { %6733 = vmatpush3.bf16.msra.mxu0 %v7528_v31  ;;  %v7578_v31 = vld [vmem:[#allocation6 + $0x290] sm:$0xff]   ;;  %v7595_v49 = vld [vmem:[#allocation6 + $0x278] sm:$0xff]   ;;  %v109_v52 = vld [vmem:[#allocation3 + $0x8] sm:$0xff] }
  0x8c   :  { %6755 = vmatpush3.bf16.msra.mxu1 %v7529_v32  ;;  %6734 = vmatprep.subr.bf16.mxu0 %v7530_v33  ;;  %v7579_v32 = vld [vmem:[#allocation6 + $0x258] sm:$0xff]   ;;  %v7591_v45 = vld [vmem:[#allocation6 + $0x270] sm:$0xff]  }
  0x8d   :  { %6756 = vmatprep.subr.bf16.mxu1 %v7531_v34  ;;  %v7580_v33 = vld [vmem:[#allocation6 + $0x2d8] sm:$0xff]   ;;  %v7593_v47 = vld [vmem:[#allocation6 + $0x230] sm:$0xff]  }
  0x8e   :  { %v7581_v34 = vld [vmem:[#allocation6 + $0x218] sm:$0xff]  }
  0x8f   :  { %6735 = vmatpush3.bf16.msra.mxu0 %v7532_v36  ;;  %v7582_v36 = vld [vmem:[#allocation6 + $0x298] sm:$0xff]  }
  0x90   :  { %6757 = vmatpush3.bf16.msra.mxu1 %v7533_v37  ;;  %6764 = vmatprep.subr.bf16.mxu0 %v7535_v41  ;;  %v7583_v37 = vld [vmem:[#allocation6 + $0x260] sm:$0xff]   ;;  %v7587_v41 = vld [vmem:[#allocation6 + $0x268] sm:$0xff]  }
  0x91   :  { %6786 = vmatprep.subr.bf16.mxu1 %v7536_v42  ;;  %v7588_v42 = vld [vmem:[#allocation6 + $0x2e8] sm:$0xff]  }
  0x92   :  { %4709 = vmatmul.mubr.bf16.vlgmr.msra.gmra.mrb[0].mxu0 %v1171_v44  ;;  %v7590_v44 = vld [vmem:[#allocation6 + $0x2a8] sm:$0xff]  }
  0x93   :  { %6765 = vmatpush3.bf16.msra.mxu0 %v7537_v46  ;;  %4749 = vmatmul.mubr.bf16.vlgmr.msra.gmra.mrb[0].mxu1 %v1193_v50  ;;  %v7592_v46 = vld [vmem:[#allocation6 + $0x2f0] sm:$0xff]   ;;  %v7596_v50 = vld [vmem:[#allocation6 + $0x2f8] sm:$0xff]  }
  0x94   :  { %6766 = vmatprep.subr.bf16.mxu0 %v7539_v51  ;;  %6787 = vmatpush3.bf16.msra.mxu1 %v7538_v48  ;;  %v7594_v48 = vld [vmem:[#allocation6 + $0x2b0] sm:$0xff]   ;;  %v7597_v51 = vld [vmem:[#allocation6 + $0x238] sm:$0xff]  }
  0x95   :  { %4788 = vmatprep.mubr.bf16.mxu0 %v1192_v54  ;;  %6788 = vmatprep.subr.bf16.mxu1 %v7540_v53  ;;  %v7598_v53 = vld [vmem:[#allocation6 + $0x2b8] sm:$0xff]   ;;  %v1204_v54 = vrot.slane %v109_v52, %v8325_v35 }
  0x96   :  { %4828 = vmatprep.mubr.bf16.mxu1 %v1196_v57 }
  0x97   :  { %6767 = vmatpush3.bf16.msra.mxu0 %v7541_v55  ;;  %v1197_v55 = vcombine.high %v109_v52, %v109_v52  ;;  %v1212_v57 = vcombine.high %v1204_v54, %v1204_v54  ;;  %v7648_v52 = vld [vmem:[#allocation6 + $0x460] sm:$0xff]  }
  0x98   :  { %6768 = vmatprep.subr.bf16.mxu0 %v7543_v58  ;;  %6789 = vmatpush3.bf16.msra.mxu1 %v7542_v56  ;;  %v7599_v56 = vld [vmem:[#allocation6 + $0x340] sm:$0xff]   ;;  %v1220_v58 = vrot.slane %v1204_v54, %v8325_v35 }
  0x99   :  { %6790 = vmatprep.subr.bf16.mxu1 %v7544_v59  ;;  %v7600_v59 = vld [vmem:[#allocation6 + $0x3c0] sm:$0xff]  }
  0x9a   :  { %v7650_v54 = vld [vmem:[#allocation6 + $0x420] sm:$0xff]  }
  0x9b   :  { %6769 = vmatpush3.bf16.msra.mxu0 %v7545_v60  ;;  %v8341_v60 = vrot.slane %v1197_v55, %v8325_v35  ;;  %v7651_v55 = vld [vmem:[#allocation6 + $0x4a0] sm:$0xff]  }
  0x9c   :  { %6770 = vmatprep.subr.bf16.mxu0 %v7547_v62  ;;  %6791 = vmatpush3.bf16.msra.mxu1 %v7546_v61  ;;  %v7601_v61 = vld [vmem:[#allocation6 + $0x300] sm:$0xff]   ;;  %v1234_v62 = vrot.slane %v1212_v57, %v8325_v35  ;;  %v7653_v57 = vld [vmem:[#allocation6 + $0x4e8] sm:$0xff]  }
  0x9d   :  { %6792 = vmatprep.subr.bf16.mxu1 %v7548_v63  ;;  %v7602_v63 = vld [vmem:[#allocation6 + $0x380] sm:$0xff]  }
  0x9f   :  { %6771 = vmatpush3.bf16.msra.mxu0 %v7549_v0  ;;  %v1213_v0 = vcombine.high %v8341_v60, %v8341_v60 }
  0xa0   :  { %6772 = vmatprep.subr.bf16.mxu0 %v7551_v2  ;;  %6793 = vmatpush3.bf16.msra.mxu1 %v7550_v1  ;;  %v1242_v1 = vcombine.high %v1220_v58, %v1220_v58  ;;  %v7603_v2 = vld [vmem:[#allocation6 + $0x348] sm:$0xff]  }
  0xa1   :  { %6794 = vmatprep.subr.bf16.mxu1 %v7552_v3  ;;  %v1244_v3 = vcombine.high %v1234_v62, %v1234_v62 }
  0xa3   :  { %6773 = vmatpush3.bf16.msra.mxu0 %v7553_v4  ;;  %v7604_v4 = vld [vmem:[#allocation6 + $0x3c8] sm:$0xff]  }
  0xa4   :  { %6774 = vmatprep.subr.bf16.mxu0 %v7555_v6  ;;  %6795 = vmatpush3.bf16.msra.mxu1 %v7554_v5  ;;  %v1241_v5 = vrot.slane %v1213_v0, %v8325_v35  ;;  %v7605_v6 = vld [vmem:[#allocation6 + $0x308] sm:$0xff]   ;;  %v7660_v0 = vld [vmem:[#allocation6 + $0x478] sm:$0xff]  }
  0xa5   :  { %6796 = vmatprep.subr.bf16.mxu1 %v7556_v7  ;;  %v7606_v7 = vld [vmem:[#allocation6 + $0x388] sm:$0xff]  }
  0xa7   :  { %6775 = vmatpush3.bf16.msra.mxu0 %v7557_v8  ;;  %v1245_v8 = vcombine.high %v1241_v5, %v1241_v5 }
  0xa8   :  { %6776 = vmatprep.subr.bf16.mxu0 %v7559_v10  ;;  %6797 = vmatpush3.bf16.msra.mxu1 %v7558_v9  ;;  %v7607_v9 = vld [vmem:[#allocation6 + $0x350] sm:$0xff]  }
  0xa9   :  { %6798 = vmatprep.subr.bf16.mxu1 %v7560_v11  ;;  %v7608_v10 = vld [vmem:[#allocation6 + $0x3d0] sm:$0xff]  }
  0xaa   :  { %v7609_v11 = vld [vmem:[#allocation6 + $0x310] sm:$0xff]  }
  0xab   :  { %6777 = vmatpush3.bf16.msra.mxu0 %v7561_v12  ;;  %v7610_v12 = vld [vmem:[#allocation6 + $0x390] sm:$0xff]  }
  0xac   :  { %6778 = vmatprep.subr.bf16.mxu0 %v7563_v14  ;;  %6799 = vmatpush3.bf16.msra.mxu1 %v7562_v13  ;;  %v7611_v13 = vld [vmem:[#allocation6 + $0x358] sm:$0xff]  }
  0xad   :  { %6800 = vmatprep.subr.bf16.mxu1 %v7564_v15  ;;  %v7612_v14 = vld [vmem:[#allocation6 + $0x3d8] sm:$0xff]  }
  0xae   :  { %v7613_v15 = vld [vmem:[#allocation6 + $0x318] sm:$0xff]  }
  0xaf   :  { %6779 = vmatpush3.bf16.msra.mxu0 %v7565_v16  ;;  %v7614_v16 = vld [vmem:[#allocation6 + $0x398] sm:$0xff]  }
  0xb0   :  { %6808 = vmatprep.subr.bf16.mxu0 %v7567_v19  ;;  %6801 = vmatpush3.bf16.msra.mxu1 %v7566_v17  ;;  %v7615_v17 = vld [vmem:[#allocation6 + $0x360] sm:$0xff]  }
  0xb1   :  { %6830 = vmatprep.subr.bf16.mxu1 %v7568_v20  ;;  %v7617_v19 = vld [vmem:[#allocation6 + $0x320] sm:$0xff]  }
  0xb2   :  { %4789 = vmatmul.mubr.bf16.vlgmr.msra.gmra.mrb[4].mxu0 %v1178_v18  ;;  %v7616_v18 = vld [vmem:[#allocation6 + $0x3e0] sm:$0xff]  }
  0xb3   :  { %6809 = vmatpush3.bf16.msra.mxu0 %v7569_v21  ;;  %4829 = vmatmul.mubr.bf16.vlgmr.msra.gmra.mrb[4].mxu1 %v1194_v23  ;;  %v7618_v20 = vld [vmem:[#allocation6 + $0x3a0] sm:$0xff]   ;;  %v7619_v21 = vld [vmem:[#allocation6 + $0x368] sm:$0xff]  }
  0xb4   :  { %6810 = vmatprep.subr.bf16.mxu0 %v7571_v24  ;;  %6831 = vmatpush3.bf16.msra.mxu1 %v7570_v22  ;;  %v7620_v22 = vld [vmem:[#allocation6 + $0x3e8] sm:$0xff]  }
  0xb5   :  { %6832 = vmatprep.subr.bf16.mxu1 %v7572_v25  ;;  %4868 = vmatprep.mubr.bf16.mxu0 %v1234_v62  ;;  %v7621_v23 = vld [vmem:[#allocation6 + $0x328] sm:$0xff]   ;;  %v7623_v25 = vld [vmem:[#allocation6 + $0x370] sm:$0xff]  }
  0xb6   :  { %4908 = vmatprep.mubr.bf16.mxu1 %v1244_v3  ;;  %v7622_v24 = vld [vmem:[#allocation6 + $0x3a8] sm:$0xff]   ;;  %v7658_v62 = vld [vmem:[#allocation6 + $0x430] sm:$0xff]  }
  0xb7   :  { %6811 = vmatpush3.bf16.msra.mxu0 %v7573_v26  ;;  %v7624_v26 = vld [vmem:[#allocation6 + $0x3f0] sm:$0xff]  }
  0xb8   :  { %6812 = vmatprep.subr.bf16.mxu0 %v7575_v28  ;;  %6833 = vmatpush3.bf16.msra.mxu1 %v7574_v27  ;;  %v7625_v27 = vld [vmem:[#allocation6 + $0x330] sm:$0xff]  }
  0xb9   :  { %6834 = vmatprep.subr.bf16.mxu1 %v7576_v29  ;;  %v7626_v28 = vld [vmem:[#allocation6 + $0x3b0] sm:$0xff]   ;;  %v7627_v29 = vld [vmem:[#allocation6 + $0x378] sm:$0xff]  }
  0xba   :  { %v110_v3 = vld [vmem:[#allocation3 + $0x10] sm:$0xff] }
  0xbb   :  { %6813 = vmatpush3.bf16.msra.mxu0 %v7577_v30  ;;  %v7628_v30 = vld [vmem:[#allocation6 + $0x3f8] sm:$0xff]  }
  0xbc   :  { %6814 = vmatprep.subr.bf16.mxu0 %v7579_v32  ;;  %6835 = vmatpush3.bf16.msra.mxu1 %v7578_v31  ;;  %v7629_v31 = vld [vmem:[#allocation6 + $0x338] sm:$0xff]  }
  0xbd   :  { %6836 = vmatprep.subr.bf16.mxu1 %v7580_v33  ;;  %v7630_v32 = vld [vmem:[#allocation6 + $0x3b8] sm:$0xff]   ;;  %v1227_v33 = vrot.slane %v8341_v60, %v8325_v35  ;;  %v7656_v60 = vld [vmem:[#allocation6 + $0x470] sm:$0xff]  }
  0xbf   :  { %6815 = vmatpush3.bf16.msra.mxu0 %v7581_v34  ;;  %v7632_v34 = vld [vmem:[#allocation6 + $0x440] sm:$0xff]  }
  0xc0   :  { %6816 = vmatprep.subr.bf16.mxu0 %v7583_v37  ;;  %6837 = vmatpush3.bf16.msra.mxu1 %v7582_v36  ;;  %v7633_v36 = vld [vmem:[#allocation6 + $0x4c0] sm:$0xff]  }
  0xc1   :  { %6838 = vmatprep.subr.bf16.mxu1 %v7584_v38  ;;  %v7634_v37 = vld [vmem:[#allocation6 + $0x400] sm:$0xff]  }
  0xc2   :  { %v7635_v38 = vld [vmem:[#allocation6 + $0x480] sm:$0xff]  }
  0xc3   :  { %6817 = vmatpush3.bf16.msra.mxu0 %v7585_v39  ;;  %v1243_v39 = vcombine.high %v1227_v33, %v1227_v33 }
  0xc4   :  { %6818 = vmatprep.subr.bf16.mxu0 %v7587_v41  ;;  %6839 = vmatpush3.bf16.msra.mxu1 %v7586_v40  ;;  %v7636_v40 = vld [vmem:[#allocation6 + $0x448] sm:$0xff]  }
  0xc5   :  { %6840 = vmatprep.subr.bf16.mxu1 %v7588_v42  ;;  %v7637_v41 = vld [vmem:[#allocation6 + $0x4c8] sm:$0xff]  }
  0xc6   :  { %v7638_v42 = vld [vmem:[#allocation6 + $0x408] sm:$0xff]  }
  0xc7   :  { %6819 = vmatpush3.bf16.msra.mxu0 %v7589_v43  ;;  %v7639_v43 = vld [vmem:[#allocation6 + $0x488] sm:$0xff]  }
  0xc8   :  { %6820 = vmatprep.subr.bf16.mxu0 %v7591_v45  ;;  %6841 = vmatpush3.bf16.msra.mxu1 %v7590_v44  ;;  %v7640_v44 = vld [vmem:[#allocation6 + $0x450] sm:$0xff]  }
  0xc9   :  { %6842 = vmatprep.subr.bf16.mxu1 %v7592_v46  ;;  %v7641_v45 = vld [vmem:[#allocation6 + $0x4d0] sm:$0xff]  }
  0xca   :  { %v7642_v46 = vld [vmem:[#allocation6 + $0x410] sm:$0xff]  }
  0xcb   :  { %6821 = vmatpush3.bf16.msra.mxu0 %v7593_v47  ;;  %v7643_v47 = vld [vmem:[#allocation6 + $0x490] sm:$0xff]  }
  0xcc   :  { %6822 = vmatprep.subr.bf16.mxu0 %v7595_v49  ;;  %6843 = vmatpush3.bf16.msra.mxu1 %v7594_v48  ;;  %v7644_v48 = vld [vmem:[#allocation6 + $0x458] sm:$0xff]  }
  0xcd   :  { %6844 = vmatprep.subr.bf16.mxu1 %v7596_v50  ;;  %v7645_v49 = vld [vmem:[#allocation6 + $0x4d8] sm:$0xff]  }
  0xce   :  { %v7646_v50 = vld [vmem:[#allocation6 + $0x418] sm:$0xff]  }
  0xcf   :  { %6823 = vmatpush3.bf16.msra.mxu0 %v7597_v51  ;;  %v7647_v51 = vld [vmem:[#allocation6 + $0x498] sm:$0xff]  }
  0xd0   :  { %6852 = vmatprep.subr.bf16.mxu0 %v7599_v56  ;;  %6845 = vmatpush3.bf16.msra.mxu1 %v7598_v53  ;;  %v7649_v53 = vld [vmem:[#allocation6 + $0x4e0] sm:$0xff]   ;;  %v7652_v56 = vld [vmem:[#allocation6 + $0x468] sm:$0xff]  }
  0xd1   :  { %6874 = vmatprep.subr.bf16.mxu1 %v7600_v59  ;;  %v7655_v59 = vld [vmem:[#allocation6 + $0x4a8] sm:$0xff]  }
  0xd2   :  { %4869 = vmatmul.mubr.bf16.vlgmr.msra.gmra.mrb[8].mxu0 %v1220_v58  ;;  %v7654_v58 = vld [vmem:[#allocation6 + $0x428] sm:$0xff]  }
  0xd3   :  { %6853 = vmatpush3.bf16.msra.mxu0 %v7601_v61  ;;  %4909 = vmatmul.mubr.bf16.vlgmr.msra.gmra.mrb[8].mxu1 %v1242_v1  ;;  %v7657_v61 = vld [vmem:[#allocation6 + $0x4f0] sm:$0xff]   ;;  %v7661_v1 = vld [vmem:[#allocation6 + $0x4f8] sm:$0xff]  }
  0xd4   :  { %6854 = vmatprep.subr.bf16.mxu0 %v7603_v2  ;;  %6875 = vmatpush3.bf16.msra.mxu1 %v7602_v63  ;;  %v7659_v63 = vld [vmem:[#allocation6 + $0x4b0] sm:$0xff]   ;;  %v7662_v2 = vld [vmem:[#allocation6 + $0x438] sm:$0xff]  }
  0xd5   :  { %4948 = vmatprep.mubr.bf16.mxu0 %v1241_v5  ;;  %6876 = vmatprep.subr.bf16.mxu1 %v7604_v4  ;;  %v7663_v4 = vld [vmem:[#allocation6 + $0x4b8] sm:$0xff]   ;;  %v1253_v5 = vrot.slane %v110_v3, %v8325_v35 }
  0xd6   :  { %4988 = vmatprep.mubr.bf16.mxu1 %v1245_v8 }
  0xd7   :  { %6855 = vmatpush3.bf16.msra.mxu0 %v7605_v6  ;;  %v1246_v6 = vcombine.high %v110_v3, %v110_v3  ;;  %v1261_v8 = vcombine.high %v1253_v5, %v1253_v5  ;;  %v7713_v3 = vld [vmem:[#allocation6 + $0x660] sm:$0xff]  }
  0xd8   :  { %6856 = vmatprep.subr.bf16.mxu0 %v7607_v9  ;;  %6877 = vmatpush3.bf16.msra.mxu1 %v7606_v7  ;;  %v7664_v7 = vld [vmem:[#allocation6 + $0x540] sm:$0xff]   ;;  %v1269_v9 = vrot.slane %v1253_v5, %v8325_v35 }
  0xd9   :  { %6878 = vmatprep.subr.bf16.mxu1 %v7608_v10  ;;  %v7665_v10 = vld [vmem:[#allocation6 + $0x5c0] sm:$0xff]  }
  0xda   :  { %v7715_v5 = vld [vmem:[#allocation6 + $0x620] sm:$0xff]  }
  0xdb   :  { %6857 = vmatpush3.bf16.msra.mxu0 %v7609_v11  ;;  %v8352_v11 = vrot.slane %v1246_v6, %v8325_v35  ;;  %v7716_v6 = vld [vmem:[#allocation6 + $0x6a0] sm:$0xff]  }
  0xdc   :  { %6858 = vmatprep.subr.bf16.mxu0 %v7611_v13  ;;  %6879 = vmatpush3.bf16.msra.mxu1 %v7610_v12  ;;  %v7666_v12 = vld [vmem:[#allocation6 + $0x500] sm:$0xff]   ;;  %v1283_v13 = vrot.slane %v1261_v8, %v8325_v35  ;;  %v7718_v8 = vld [vmem:[#allocation6 + $0x6e8] sm:$0xff]  }
  0xdd   :  { %6880 = vmatprep.subr.bf16.mxu1 %v7612_v14  ;;  %v7667_v14 = vld [vmem:[#allocation6 + $0x580] sm:$0xff]  }
  0xdf   :  { %6859 = vmatpush3.bf16.msra.mxu0 %v7613_v15  ;;  %v1262_v15 = vcombine.high %v8352_v11, %v8352_v11 }
  0xe0   :  { %6860 = vmatprep.subr.bf16.mxu0 %v7615_v17  ;;  %6881 = vmatpush3.bf16.msra.mxu1 %v7614_v16  ;;  %v1291_v16 = vcombine.high %v1269_v9, %v1269_v9  ;;  %v7668_v17 = vld [vmem:[#allocation6 + $0x548] sm:$0xff]  }
  0xe1   :  { %6882 = vmatprep.subr.bf16.mxu1 %v7616_v18  ;;  %v1293_v18 = vcombine.high %v1283_v13, %v1283_v13 }
  0xe3   :  { %6861 = vmatpush3.bf16.msra.mxu0 %v7617_v19  ;;  %v7669_v19 = vld [vmem:[#allocation6 + $0x5c8] sm:$0xff]  }
  0xe4   :  { %6862 = vmatprep.subr.bf16.mxu0 %v7619_v21  ;;  %6883 = vmatpush3.bf16.msra.mxu1 %v7618_v20  ;;  %v1290_v20 = vrot.slane %v1262_v15, %v8325_v35  ;;  %v7670_v21 = vld [vmem:[#allocation6 + $0x508] sm:$0xff]   ;;  %v7725_v15 = vld [vmem:[#allocation6 + $0x678] sm:$0xff]  }
  0xe5   :  { %6884 = vmatprep.subr.bf16.mxu1 %v7620_v22  ;;  %v7671_v22 = vld [vmem:[#allocation6 + $0x588] sm:$0xff]  }
  0xe7   :  { %6863 = vmatpush3.bf16.msra.mxu0 %v7621_v23  ;;  %v1294_v23 = vcombine.high %v1290_v20, %v1290_v20 }
  0xe8   :  { %6864 = vmatprep.subr.bf16.mxu0 %v7623_v25  ;;  %6885 = vmatpush3.bf16.msra.mxu1 %v7622_v24  ;;  %v7672_v24 = vld [vmem:[#allocation6 + $0x550] sm:$0xff]  }
  0xe9   :  { %6886 = vmatprep.subr.bf16.mxu1 %v7624_v26  ;;  %v7673_v25 = vld [vmem:[#allocation6 + $0x5d0] sm:$0xff]  }
  0xea   :  { %v7674_v26 = vld [vmem:[#allocation6 + $0x510] sm:$0xff]  }
  0xeb   :  { %6865 = vmatpush3.bf16.msra.mxu0 %v7625_v27  ;;  %v7675_v27 = vld [vmem:[#allocation6 + $0x590] sm:$0xff]  }
  0xec   :  { %6866 = vmatprep.subr.bf16.mxu0 %v7627_v29  ;;  %6887 = vmatpush3.bf16.msra.mxu1 %v7626_v28  ;;  %v7676_v28 = vld [vmem:[#allocation6 + $0x558] sm:$0xff]  }
  0xed   :  { %6888 = vmatprep.subr.bf16.mxu1 %v7628_v30  ;;  %v7677_v29 = vld [vmem:[#allocation6 + $0x5d8] sm:$0xff]  }
  0xee   :  { %v7678_v30 = vld [vmem:[#allocation6 + $0x518] sm:$0xff]  }
  0xef   :  { %6867 = vmatpush3.bf16.msra.mxu0 %v7629_v31  ;;  %v7679_v31 = vld [vmem:[#allocation6 + $0x598] sm:$0xff]  }
  0xf0   :  { %6896 = vmatprep.subr.bf16.mxu0 %v7632_v34  ;;  %6889 = vmatpush3.bf16.msra.mxu1 %v7630_v32  ;;  %v7680_v32 = vld [vmem:[#allocation6 + $0x560] sm:$0xff]  }
  0xf1   :  { %6918 = vmatprep.subr.bf16.mxu1 %v7633_v36  ;;  %v7682_v34 = vld [vmem:[#allocation6 + $0x520] sm:$0xff]  }
  0xf2   :  { %4949 = vmatmul.mubr.bf16.vlgmr.msra.gmra.mrb[12].mxu0 %v1227_v33  ;;  %v7681_v33 = vld [vmem:[#allocation6 + $0x5e0] sm:$0xff]  }
  0xf3   :  { %6897 = vmatpush3.bf16.msra.mxu0 %v7634_v37  ;;  %4989 = vmatmul.mubr.bf16.vlgmr.msra.gmra.mrb[12].mxu1 %v1243_v39  ;;  %v7683_v36 = vld [vmem:[#allocation6 + $0x5a0] sm:$0xff]   ;;  %v7684_v37 = vld [vmem:[#allocation6 + $0x568] sm:$0xff]  }
  0xf4   :  { %6898 = vmatprep.subr.bf16.mxu0 %v7636_v40  ;;  %6919 = vmatpush3.bf16.msra.mxu1 %v7635_v38  ;;  %v7685_v38 = vld [vmem:[#allocation6 + $0x5e8] sm:$0xff]  }
  0xf5   :  { %6920 = vmatprep.subr.bf16.mxu1 %v7637_v41  ;;  %5028 = vmatprep.mubr.bf16.mxu0 %v1283_v13  ;;  %v7686_v39 = vld [vmem:[#allocation6 + $0x528] sm:$0xff]   ;;  %v7688_v41 = vld [vmem:[#allocation6 + $0x570] sm:$0xff]  }
  0xf6   :  { %5068 = vmatprep.mubr.bf16.mxu1 %v1293_v18  ;;  %v7687_v40 = vld [vmem:[#allocation6 + $0x5a8] sm:$0xff]   ;;  %v7723_v13 = vld [vmem:[#allocation6 + $0x630] sm:$0xff]   ;;  %v111_v18 = vld [vmem:[#allocation3 + $0x18] sm:$0xff] }
  0xf7   :  { %6899 = vmatpush3.bf16.msra.mxu0 %v7638_v42  ;;  %v7689_v42 = vld [vmem:[#allocation6 + $0x5f0] sm:$0xff]  }
  0xf8   :  { %6900 = vmatprep.subr.bf16.mxu0 %v7640_v44  ;;  %6921 = vmatpush3.bf16.msra.mxu1 %v7639_v43  ;;  %v7690_v43 = vld [vmem:[#allocation6 + $0x530] sm:$0xff]  }
  0xf9   :  { %6922 = vmatprep.subr.bf16.mxu1 %v7641_v45  ;;  %v7691_v44 = vld [vmem:[#allocation6 + $0x5b0] sm:$0xff]   ;;  %v7692_v45 = vld [vmem:[#allocation6 + $0x578] sm:$0xff]  }
  0xfb   :  { %6901 = vmatpush3.bf16.msra.mxu0 %v7642_v46  ;;  %v7693_v46 = vld [vmem:[#allocation6 + $0x5f8] sm:$0xff]  }
  0xfc   :  { %6902 = vmatprep.subr.bf16.mxu0 %v7644_v48  ;;  %6923 = vmatpush3.bf16.msra.mxu1 %v7643_v47  ;;  %v7694_v47 = vld [vmem:[#allocation6 + $0x538] sm:$0xff]  }
  0xfd   :  { %6924 = vmatprep.subr.bf16.mxu1 %v7645_v49  ;;  %v7695_v48 = vld [vmem:[#allocation6 + $0x5b8] sm:$0xff]   ;;  %v1276_v49 = vrot.slane %v8352_v11, %v8325_v35  ;;  %v7721_v11 = vld [vmem:[#allocation6 + $0x670] sm:$0xff]  }
  0xff   :  { %6903 = vmatpush3.bf16.msra.mxu0 %v7646_v50  ;;  %v7697_v50 = vld [vmem:[#allocation6 + $0x640] sm:$0xff]  }
 0x100   :  { %6904 = vmatprep.subr.bf16.mxu0 %v7648_v52  ;;  %6925 = vmatpush3.bf16.msra.mxu1 %v7647_v51  ;;  %v7698_v51 = vld [vmem:[#allocation6 + $0x6c0] sm:$0xff]  }
 0x101   :  { %6926 = vmatprep.subr.bf16.mxu1 %v7649_v53  ;;  %v7699_v52 = vld [vmem:[#allocation6 + $0x600] sm:$0xff]  }
 0x102   :  { %v7700_v53 = vld [vmem:[#allocation6 + $0x680] sm:$0xff]  }
 0x103   :  { %6905 = vmatpush3.bf16.msra.mxu0 %v7650_v54  ;;  %v1292_v54 = vcombine.high %v1276_v49, %v1276_v49 }
 0x104   :  { %6906 = vmatprep.subr.bf16.mxu0 %v7652_v56  ;;  %6927 = vmatpush3.bf16.msra.mxu1 %v7651_v55  ;;  %v7701_v55 = vld [vmem:[#allocation6 + $0x648] sm:$0xff]  }
 0x105   :  { %6928 = vmatprep.subr.bf16.mxu1 %v7653_v57  ;;  %v7702_v56 = vld [vmem:[#allocation6 + $0x6c8] sm:$0xff]  }
 0x106   :  { %v7703_v57 = vld [vmem:[#allocation6 + $0x608] sm:$0xff]  }
 0x107   :  { %6907 = vmatpush3.bf16.msra.mxu0 %v7654_v58  ;;  %v7704_v58 = vld [vmem:[#allocation6 + $0x688] sm:$0xff]  }
 0x108   :  { %6908 = vmatprep.subr.bf16.mxu0 %v7656_v60  ;;  %6929 = vmatpush3.bf16.msra.mxu1 %v7655_v59  ;;  %v7705_v59 = vld [vmem:[#allocation6 + $0x650] sm:$0xff]  }
 0x109   :  { %6930 = vmatprep.subr.bf16.mxu1 %v7657_v61  ;;  %v7706_v60 = vld [vmem:[#allocation6 + $0x6d0] sm:$0xff]  }
 0x10a   :  { %v7707_v61 = vld [vmem:[#allocation6 + $0x610] sm:$0xff]  }
 0x10b   :  { %6909 = vmatpush3.bf16.msra.mxu0 %v7658_v62  ;;  %v7708_v62 = vld [vmem:[#allocation6 + $0x690] sm:$0xff]  }
 0x10c   :  { %6910 = vmatprep.subr.bf16.mxu0 %v7660_v0  ;;  %6931 = vmatpush3.bf16.msra.mxu1 %v7659_v63  ;;  %v7709_v63 = vld [vmem:[#allocation6 + $0x658] sm:$0xff]  }
 0x10d   :  { %6932 = vmatprep.subr.bf16.mxu1 %v7661_v1  ;;  %v7710_v0 = vld [vmem:[#allocation6 + $0x6d8] sm:$0xff]  }
 0x10e   :  { %v7711_v1 = vld [vmem:[#allocation6 + $0x618] sm:$0xff]  }
 0x10f   :  { %6911 = vmatpush3.bf16.msra.mxu0 %v7662_v2  ;;  %v7712_v2 = vld [vmem:[#allocation6 + $0x698] sm:$0xff]  }
 0x110   :  { %6940 = vmatprep.subr.bf16.mxu0 %v7664_v7  ;;  %6933 = vmatpush3.bf16.msra.mxu1 %v7663_v4  ;;  %v7714_v4 = vld [vmem:[#allocation6 + $0x6e0] sm:$0xff]   ;;  %v7717_v7 = vld [vmem:[#allocation6 + $0x668] sm:$0xff]  }
 0x111   :  { %6962 = vmatprep.subr.bf16.mxu1 %v7665_v10  ;;  %v7720_v10 = vld [vmem:[#allocation6 + $0x6a8] sm:$0xff]  }
 0x112   :  { %5029 = vmatmul.mubr.bf16.vlgmr.msra.gmra.mrb[16].mxu0 %v1269_v9  ;;  %v7719_v9 = vld [vmem:[#allocation6 + $0x628] sm:$0xff]  }
 0x113   :  { %6941 = vmatpush3.bf16.msra.mxu0 %v7666_v12  ;;  %5069 = vmatmul.mubr.bf16.vlgmr.msra.gmra.mrb[16].mxu1 %v1291_v16  ;;  %v7722_v12 = vld [vmem:[#allocation6 + $0x6f0] sm:$0xff]   ;;  %v7726_v16 = vld [vmem:[#allocation6 + $0x6f8] sm:$0xff]  }
 0x114   :  { %6942 = vmatprep.subr.bf16.mxu0 %v7668_v17  ;;  %6963 = vmatpush3.bf16.msra.mxu1 %v7667_v14  ;;  %v7724_v14 = vld [vmem:[#allocation6 + $0x6b0] sm:$0xff]   ;;  %v7727_v17 = vld [vmem:[#allocation6 + $0x638] sm:$0xff]  }
 0x115   :  { %5108 = vmatprep.mubr.bf16.mxu0 %v1290_v20  ;;  %6964 = vmatprep.subr.bf16.mxu1 %v7669_v19  ;;  %v1302_v19 = vrot.slane %v111_v18, %v8325_v35  ;;  %v7729_v20 = vld [vmem:[#allocation6 + $0x740] sm:$0xff]  }
 0x116   :  { %5148 = vmatprep.mubr.bf16.mxu1 %v1294_v23 }
 0x117   :  { %6943 = vmatpush3.bf16.msra.mxu0 %v7670_v21  ;;  %v1295_v21 = vcombine.high %v111_v18, %v111_v18  ;;  %v1310_v23 = vcombine.high %v1302_v19, %v1302_v19  ;;  %v7767_v18 = vld [vmem:[#allocation6 + $0x8c8] sm:$0xff]  }
 0x118   :  { %6944 = vmatprep.subr.bf16.mxu0 %v7672_v24  ;;  %6965 = vmatpush3.bf16.msra.mxu1 %v7671_v22  ;;  %v7728_v22 = vld [vmem:[#allocation6 + $0x6b8] sm:$0xff]   ;;  %v1318_v24 = vrot.slane %v1302_v19, %v8325_v35  ;;  %v7768_v19 = vld [vmem:[#allocation6 + $0x808] sm:$0xff]  }
 0x119   :  { %6966 = vmatprep.subr.bf16.mxu1 %v7673_v25  ;;  %v7730_v25 = vld [vmem:[#allocation6 + $0x7c0] sm:$0xff]  }
 0x11b   :  { %6945 = vmatpush3.bf16.msra.mxu0 %v7674_v26  ;;  %v8363_v26 = vrot.slane %v1295_v21, %v8325_v35  ;;  %v7769_v21 = vld [vmem:[#allocation6 + $0x888] sm:$0xff]  }
 0x11c   :  { %6946 = vmatprep.subr.bf16.mxu0 %v7676_v28  ;;  %6967 = vmatpush3.bf16.msra.mxu1 %v7675_v27  ;;  %v1332_v27 = vrot.slane %v1310_v23, %v8325_v35  ;;  %v7731_v28 = vld [vmem:[#allocation6 + $0x700] sm:$0xff]   ;;  %v7772_v23 = vld [vmem:[#allocation6 + $0x810] sm:$0xff]  }
 0x11d   :  { %6968 = vmatprep.subr.bf16.mxu1 %v7677_v29  ;;  %v1311_v29 = vcombine.high %v8363_v26, %v8363_v26 }
 0x11f   :  { %6947 = vmatpush3.bf16.msra.mxu0 %v7678_v30  ;;  %v1340_v30 = vcombine.high %v1318_v24, %v1318_v24 }
 0x120   :  { %6948 = vmatprep.subr.bf16.mxu0 %v7680_v32  ;;  %6969 = vmatpush3.bf16.msra.mxu1 %v7679_v31  ;;  %v7733_v31 = vld [vmem:[#allocation6 + $0x748] sm:$0xff]   ;;  %v1342_v32 = vcombine.high %v1332_v27, %v1332_v27 }
 0x121   :  { %6970 = vmatprep.subr.bf16.mxu1 %v7681_v33  ;;  %v7732_v33 = vld [vmem:[#allocation6 + $0x780] sm:$0xff]  }
 0x123   :  { %6949 = vmatpush3.bf16.msra.mxu0 %v7682_v34  ;;  %v1339_v34 = vrot.slane %v1311_v29, %v8325_v35  ;;  %v7777_v29 = vld [vmem:[#allocation6 + $0x898] sm:$0xff]  }
 0x124   :  { %6950 = vmatprep.subr.bf16.mxu0 %v7684_v37  ;;  %6971 = vmatpush3.bf16.msra.mxu1 %v7683_v36  ;;  %v7734_v36 = vld [vmem:[#allocation6 + $0x7c8] sm:$0xff]  }
 0x125   :  { %6972 = vmatprep.subr.bf16.mxu1 %v7685_v38  ;;  %v7735_v37 = vld [vmem:[#allocation6 + $0x708] sm:$0xff]   ;;  %v1343_v38 = vcombine.high %v1339_v34, %v1339_v34 }
 0x127   :  { %6951 = vmatpush3.bf16.msra.mxu0 %v7686_v39  ;;  %v7737_v39 = vld [vmem:[#allocation6 + $0x750] sm:$0xff]  }
 0x128   :  { %6952 = vmatprep.subr.bf16.mxu0 %v7688_v41  ;;  %6973 = vmatpush3.bf16.msra.mxu1 %v7687_v40  ;;  %v7736_v40 = vld [vmem:[#allocation6 + $0x788] sm:$0xff]   ;;  %v7738_v41 = vld [vmem:[#allocation6 + $0x7d0] sm:$0xff]  }
 0x129   :  { %6974 = vmatprep.subr.bf16.mxu1 %v7689_v42  ;;  %v7739_v42 = vld [vmem:[#allocation6 + $0x710] sm:$0xff]  }
 0x12b   :  { %6953 = vmatpush3.bf16.msra.mxu0 %v7690_v43  ;;  %v7741_v43 = vld [vmem:[#allocation6 + $0x758] sm:$0xff]  }
 0x12c   :  { %6954 = vmatprep.subr.bf16.mxu0 %v7692_v45  ;;  %6975 = vmatpush3.bf16.msra.mxu1 %v7691_v44  ;;  %v7740_v44 = vld [vmem:[#allocation6 + $0x790] sm:$0xff]   ;;  %v7742_v45 = vld [vmem:[#allocation6 + $0x7d8] sm:$0xff]  }
 0x12d   :  { %6976 = vmatprep.subr.bf16.mxu1 %v7693_v46  ;;  %v7743_v46 = vld [vmem:[#allocation6 + $0x718] sm:$0xff]  }
 0x12f   :  { %6955 = vmatpush3.bf16.msra.mxu0 %v7694_v47  ;;  %v7745_v47 = vld [vmem:[#allocation6 + $0x760] sm:$0xff]  }
 0x130   :  { %6984 = vmatprep.subr.bf16.mxu0 %v7697_v50  ;;  %6977 = vmatpush3.bf16.msra.mxu1 %v7695_v48  ;;  %v7744_v48 = vld [vmem:[#allocation6 + $0x798] sm:$0xff]   ;;  %v7747_v50 = vld [vmem:[#allocation6 + $0x720] sm:$0xff]  }
 0x131   :  { %7006 = vmatprep.subr.bf16.mxu1 %v7698_v51  ;;  %v7749_v51 = vld [vmem:[#allocation6 + $0x768] sm:$0xff]  }
 0x132   :  { %5109 = vmatmul.mubr.bf16.vlgmr.msra.gmra.mrb[20].mxu0 %v1276_v49  ;;  %v7746_v49 = vld [vmem:[#allocation6 + $0x7e0] sm:$0xff]  }
 0x133   :  { %6985 = vmatpush3.bf16.msra.mxu0 %v7699_v52  ;;  %5149 = vmatmul.mubr.bf16.vlgmr.msra.gmra.mrb[20].mxu1 %v1292_v54  ;;  %v7748_v52 = vld [vmem:[#allocation6 + $0x7a0] sm:$0xff]   ;;  %v7751_v54 = vld [vmem:[#allocation6 + $0x728] sm:$0xff]  }
 0x134   :  { %6986 = vmatprep.subr.bf16.mxu0 %v7701_v55  ;;  %7007 = vmatpush3.bf16.msra.mxu1 %v7700_v53  ;;  %v7750_v53 = vld [vmem:[#allocation6 + $0x7e8] sm:$0xff]  }
 0x135   :  { %7008 = vmatprep.subr.bf16.mxu1 %v7702_v56  ;;  %5188 = vmatprep.mubr.bf16.mxu0 %v1332_v27  ;;  %v7753_v56 = vld [vmem:[#allocation6 + $0x770] sm:$0xff]   ;;  %v7776_v27 = vld [vmem:[#allocation6 + $0x818] sm:$0xff]  }
 0x136   :  { %5228 = vmatprep.mubr.bf16.mxu1 %v1342_v32  ;;  %v7782_v32 = vld [vmem:[#allocation6 + $0x868] sm:$0xff]  }
 0x137   :  { %6987 = vmatpush3.bf16.msra.mxu0 %v7703_v57 }
 0x138   :  { %6988 = vmatprep.subr.bf16.mxu0 %v7705_v59  ;;  %7009 = vmatpush3.bf16.msra.mxu1 %v7704_v58  ;;  %v7752_v58 = vld [vmem:[#allocation6 + $0x7a8] sm:$0xff]  }
 0x139   :  { %7010 = vmatprep.subr.bf16.mxu1 %v7706_v60 }
 0x13b   :  { %6989 = vmatpush3.bf16.msra.mxu0 %v7707_v61 }
 0x13c   :  { %6990 = vmatprep.subr.bf16.mxu0 %v7709_v63  ;;  %7011 = vmatpush3.bf16.msra.mxu1 %v7708_v62  ;;  %v7754_v62 = vld [vmem:[#allocation6 + $0x7f0] sm:$0xff]  }
 0x13d   :  { %7012 = vmatprep.subr.bf16.mxu1 %v7710_v0  ;;  %v7755_v63 = vld [vmem:[#allocation6 + $0x730] sm:$0xff]  }
 0x13f   :  { %6991 = vmatpush3.bf16.msra.mxu0 %v7711_v1 }
 0x140   :  { %6992 = vmatprep.subr.bf16.mxu0 %v7713_v3  ;;  %7013 = vmatpush3.bf16.msra.mxu1 %v7712_v2 }
 0x141   :  { %7014 = vmatprep.subr.bf16.mxu1 %v7714_v4  ;;  %v7757_v4 = vld [vmem:[#allocation6 + $0x778] sm:$0xff]  }
 0x143   :  { %6993 = vmatpush3.bf16.msra.mxu0 %v7715_v5 }
 0x144   :  { %6994 = vmatprep.subr.bf16.mxu0 %v7717_v7  ;;  %7015 = vmatpush3.bf16.msra.mxu1 %v7716_v6  ;;  %v7756_v6 = vld [vmem:[#allocation6 + $0x7b0] sm:$0xff]  }
 0x145   :  { %7016 = vmatprep.subr.bf16.mxu1 %v7718_v8  ;;  %v7758_v8 = vld [vmem:[#allocation6 + $0x7f8] sm:$0xff]  }
 0x147   :  { %6995 = vmatpush3.bf16.msra.mxu0 %v7719_v9  ;;  %v7759_v9 = vld [vmem:[#allocation6 + $0x738] sm:$0xff]  }
 0x148   :  { %6996 = vmatprep.subr.bf16.mxu0 %v7721_v11  ;;  %7017 = vmatpush3.bf16.msra.mxu1 %v7720_v10  ;;  %v1325_v10 = vrot.slane %v8363_v26, %v8325_v35  ;;  %v7762_v11 = vld [vmem:[#allocation6 + $0x840] sm:$0xff]   ;;  %v7775_v26 = vld [vmem:[#allocation6 + $0x8d8] sm:$0xff]  }
 0x149   :  { %7018 = vmatprep.subr.bf16.mxu1 %v7722_v12  ;;  %v7760_v12 = vld [vmem:[#allocation6 + $0x7b8] sm:$0xff]  }
 0x14b   :  { %6997 = vmatpush3.bf16.msra.mxu0 %v7723_v13  ;;  %v7763_v13 = vld [vmem:[#allocation6 + $0x8c0] sm:$0xff]  }
 0x14c   :  { %6998 = vmatprep.subr.bf16.mxu0 %v7725_v15  ;;  %7019 = vmatpush3.bf16.msra.mxu1 %v7724_v14  ;;  %v7764_v14 = vld [vmem:[#allocation6 + $0x800] sm:$0xff]   ;;  %v1341_v15 = vcombine.high %v1325_v10, %v1325_v10 }
 0x14d   :  { %7020 = vmatprep.subr.bf16.mxu1 %v7726_v16  ;;  %v7766_v16 = vld [vmem:[#allocation6 + $0x848] sm:$0xff]  }
 0x14f   :  { %6999 = vmatpush3.bf16.msra.mxu0 %v7727_v17  ;;  %v7765_v17 = vld [vmem:[#allocation6 + $0x880] sm:$0xff]  }
 0x150   :  { %7028 = vmatprep.subr.bf16.mxu0 %v7729_v20  ;;  %7021 = vmatpush3.bf16.msra.mxu1 %v7728_v22  ;;  %v7770_v20 = vld [vmem:[#allocation6 + $0x850] sm:$0xff]  }
 0x151   :  { %7050 = vmatprep.subr.bf16.mxu1 %v7730_v25  ;;  %v7771_v22 = vld [vmem:[#allocation6 + $0x8d0] sm:$0xff]  }
 0x152   :  { %5189 = vmatmul.mubr.bf16.vlgmr.msra.gmra.mrb[24].mxu0 %v1318_v24  ;;  %v7774_v24 = vld [vmem:[#allocation6 + $0x858] sm:$0xff]   ;;  %v7773_v25 = vld [vmem:[#allocation6 + $0x890] sm:$0xff]  }
 0x153   :  { %7029 = vmatpush3.bf16.msra.mxu0 %v7731_v28  ;;  %5229 = vmatmul.mubr.bf16.vlgmr.msra.gmra.mrb[24].mxu1 %v1340_v30  ;;  %v7778_v28 = vld [vmem:[#allocation6 + $0x860] sm:$0xff]  }
 0x154   :  { %7030 = vmatprep.subr.bf16.mxu0 %v7733_v31  ;;  %7051 = vmatpush3.bf16.msra.mxu1 %v7732_v33  ;;  %v7779_v30 = vld [vmem:[#allocation6 + $0x8e0] sm:$0xff]  }
 0x155   :  { %5268 = vmatprep.mubr.bf16.mxu0 %v1339_v34  ;;  %7052 = vmatprep.subr.bf16.mxu1 %v7734_v36  ;;  %v7780_v31 = vld [vmem:[#allocation6 + $0x820] sm:$0xff]   ;;  %v7783_v34 = vld [vmem:[#allocation6 + $0x8e8] sm:$0xff]  }
 0x156   :  { %5308 = vmatprep.mubr.bf16.mxu1 %v1343_v38  ;;  %v7781_v33 = vld [vmem:[#allocation6 + $0x8a0] sm:$0xff]   ;;  %v7784_v36 = vld [vmem:[#allocation6 + $0x828] sm:$0xff]   ;;  %v7786_v38 = vld [vmem:[#allocation6 + $0x870] sm:$0xff]  }
 0x157   :  { %7031 = vmatpush3.bf16.msra.mxu0 %v7735_v37 }
 0x158   :  { %7032 = vmatprep.subr.bf16.mxu0 %v7737_v39  ;;  %7053 = vmatpush3.bf16.msra.mxu1 %v7736_v40  ;;  %v7785_v40 = vld [vmem:[#allocation6 + $0x8a8] sm:$0xff]  }
 0x159   :  { %7054 = vmatprep.subr.bf16.mxu1 %v7738_v41 }
 0x15b   :  { %7033 = vmatpush3.bf16.msra.mxu0 %v7739_v42 }
 0x15c   :  { %7034 = vmatprep.subr.bf16.mxu0 %v7741_v43  ;;  %7055 = vmatpush3.bf16.msra.mxu1 %v7740_v44  ;;  %v7787_v44 = vld [vmem:[#allocation6 + $0x8f0] sm:$0xff]  }
 0x15d   :  { %7056 = vmatprep.subr.bf16.mxu1 %v7742_v45  ;;  %v7788_v45 = vld [vmem:[#allocation6 + $0x830] sm:$0xff]  }
 0x15f   :  { %7035 = vmatpush3.bf16.msra.mxu0 %v7743_v46 }
 0x160   :  { %7036 = vmatprep.subr.bf16.mxu0 %v7745_v47  ;;  %7057 = vmatpush3.bf16.msra.mxu1 %v7744_v48  ;;  %v7789_v48 = vld [vmem:[#allocation6 + $0x8b0] sm:$0xff]  }
 0x161   :  { %7058 = vmatprep.subr.bf16.mxu1 %v7746_v49 }
 0x163   :  { %7037 = vmatpush3.bf16.msra.mxu0 %v7747_v50 }
 0x164   :  { %7038 = vmatprep.subr.bf16.mxu0 %v7749_v51  ;;  %7059 = vmatpush3.bf16.msra.mxu1 %v7748_v52  ;;  %v7790_v52 = vld [vmem:[#allocation6 + $0x878] sm:$0xff]  }
 0x165   :  { %v6736_v55 = vpop.f32.mrb[0].mxu0  ;;  %7060 = vmatprep.subr.bf16.mxu1 %v7750_v53 }
 0x166   :  { %v6737_v57 = vpop.f32.mrb[1].mxu0  ;;  %v6758_v59 = vpop.f32.mrb[0].mxu1 }
 0x167   :  { %v6738_v60 = vadd.f32 %v6737_v57, %v6736_v55  ;;  %v6739_v61 = vpop.f32.mrb[2].mxu0  ;;  %v6759_v0 = vpop.f32.mrb[1].mxu1  ;;  %7039 = vmatpush3.bf16.msra.mxu0 %v7751_v54  ;;  %v7791_v54 = vld [vmem:[#allocation6 + $0x8f8] sm:$0xff]   ;;  %v112_v57 = vld [vmem:[#allocation3 + $0x20] sm:$0xff] }
 0x168   :  { %v6740_v1 = vpop.f32.mrb[3].mxu0  ;;  %v6760_v2 = vadd.f32 %v6759_v0, %v6758_v59  ;;  %v6761_v3 = vpop.f32.mrb[2].mxu1  ;;  %7040 = vmatprep.subr.bf16.mxu0 %v7753_v56  ;;  %7061 = vmatpush3.bf16.msra.mxu1 %v7752_v58  ;;  %v7792_v56 = vld [vmem:[#allocation6 + $0x838] sm:$0xff]   ;;  %v1351_v58 = vrot.slane %v112_v57, %v8325_v35  ;;  %v7794_v59 = vld [vmem:[#allocation6 + $0x940] sm:$0xff]  }
 0x169   :  { %v6762_v5 = vpop.f32.mrb[3].mxu1  ;;  %7062 = vmatprep.subr.bf16.mxu1 %v7754_v62  ;;  %v7793_v61 = vld [vmem:[#allocation6 + $0x8b8] sm:$0xff]   ;;  %v7795_v0 = vld [vmem:[#allocation6 + $0x9c0] sm:$0xff]  }
 0x16a   :  { %v8369_v7 = vadd.f32 %v6760_v2, %v6738_v60  ;;  %v1344_v60 = vcombine.high %v112_v57, %v112_v57  ;;  %v1359_v62 = vcombine.high %v1351_v58, %v1351_v58  ;;  %v7796_v2 = vld [vmem:[#allocation6 + $0x900] sm:$0xff]   ;;  %v7831_v57 = vld [vmem:[#allocation6 + $0xa48] sm:$0xff]  }
 0x16b   :  { %7041 = vmatpush3.bf16.msra.mxu0 %v7755_v63  ;;  %v1367_v63 = vrot.slane %v1351_v58, %v8325_v35  ;;  %v7832_v58 = vld [vmem:[#allocation6 + $0xac8] sm:$0xff]  }
 0x16c   :  { %7042 = vmatprep.subr.bf16.mxu0 %v7757_v4  ;;  %7063 = vmatpush3.bf16.msra.mxu1 %v7756_v6  ;;  %v8379_v1 = vrot.slane %v1344_v60, %v8325_v35  ;;  %v1381_v3 = vrot.slane %v1359_v62, %v8325_v35  ;;  %v7797_v4 = vld [vmem:[#allocation6 + $0x980] sm:$0xff]   ;;  %v7834_v60 = vld [vmem:[#allocation6 + $0xa88] sm:$0xff]   ;;  %v7836_v62 = vld [vmem:[#allocation6 + $0xad0] sm:$0xff]  }
 0x16d   :  { %7064 = vmatprep.subr.bf16.mxu1 %v7758_v8  ;;  %v1389_v6 = vcombine.high %v1367_v63, %v1367_v63 }
 0x16e   :  { %v1360_v5 = vcombine.high %v8379_v1, %v8379_v1  ;;  %v1391_v8 = vcombine.high %v1381_v3, %v1381_v3 }
 0x16f   :  { %7043 = vmatpush3.bf16.msra.mxu0 %v7759_v9  ;;  %v7799_v9 = vld [vmem:[#allocation6 + $0x9c8] sm:$0xff]  }
 0x170   :  { %7072 = vmatprep.subr.bf16.mxu0 %v7762_v11  ;;  %7065 = vmatpush3.bf16.msra.mxu1 %v7760_v12  ;;  %v7800_v11 = vld [vmem:[#allocation6 + $0x908] sm:$0xff]  }
 0x171   :  { %7094 = vmatprep.subr.bf16.mxu1 %v7763_v13  ;;  %v7801_v12 = vld [vmem:[#allocation6 + $0x988] sm:$0xff]  }
 0x172   :  { %5269 = vmatmul.mubr.bf16.vlgmr.msra.gmra.mrb[28].mxu0 %v1325_v10  ;;  %v1388_v10 = vrot.slane %v1360_v5, %v8325_v35  ;;  %v7843_v5 = vld [vmem:[#allocation6 + $0xa60] sm:$0xff]  }
 0x173   :  { %7073 = vmatpush3.bf16.msra.mxu0 %v7764_v14  ;;  %5309 = vmatmul.mubr.bf16.vlgmr.msra.gmra.mrb[28].mxu1 %v1341_v15  ;;  %v7802_v14 = vld [vmem:[#allocation6 + $0x950] sm:$0xff]  }
 0x174   :  { %7074 = vmatprep.subr.bf16.mxu0 %v7766_v16  ;;  %7095 = vmatpush3.bf16.msra.mxu1 %v7765_v17  ;;  %v1392_v13 = vcombine.high %v1388_v10, %v1388_v10  ;;  %v7803_v15 = vld [vmem:[#allocation6 + $0x9d0] sm:$0xff]  }
 0x175   :  { %7096 = vmatprep.subr.bf16.mxu1 %v7767_v18  ;;  %5348 = vmatprep.mubr.bf16.mxu0 %v1381_v3  ;;  %v7804_v16 = vld [vmem:[#allocation6 + $0x910] sm:$0xff]   ;;  %v7806_v18 = vld [vmem:[#allocation6 + $0x958] sm:$0xff]  }
 0x176   :  { %5388 = vmatprep.mubr.bf16.mxu1 %v1391_v8  ;;  %v7805_v17 = vld [vmem:[#allocation6 + $0x990] sm:$0xff]   ;;  %v7841_v3 = vld [vmem:[#allocation6 + $0xa18] sm:$0xff]   ;;  %v7846_v8 = vld [vmem:[#allocation6 + $0xaa0] sm:$0xff]  }
 0x177   :  { %7075 = vmatpush3.bf16.msra.mxu0 %v7768_v19  ;;  %v7807_v19 = vld [vmem:[#allocation6 + $0x9d8] sm:$0xff]  }
 0x178   :  { %7076 = vmatprep.subr.bf16.mxu0 %v7770_v20  ;;  %7097 = vmatpush3.bf16.msra.mxu1 %v7769_v21  ;;  %v7808_v20 = vld [vmem:[#allocation6 + $0x918] sm:$0xff]  }
 0x179   :  { %7098 = vmatprep.subr.bf16.mxu1 %v7771_v22  ;;  %v7809_v21 = vld [vmem:[#allocation6 + $0x998] sm:$0xff]   ;;  %v7810_v22 = vld [vmem:[#allocation6 + $0x960] sm:$0xff]  }
 0x17b   :  { %7077 = vmatpush3.bf16.msra.mxu0 %v7772_v23  ;;  %v7811_v23 = vld [vmem:[#allocation6 + $0x9e0] sm:$0xff]  }
 0x17c   :  { %7078 = vmatprep.subr.bf16.mxu0 %v7774_v24  ;;  %7099 = vmatpush3.bf16.msra.mxu1 %v7773_v25  ;;  %v7812_v24 = vld [vmem:[#allocation6 + $0x920] sm:$0xff]  }
 0x17d   :  { %7100 = vmatprep.subr.bf16.mxu1 %v7775_v26  ;;  %v7813_v25 = vld [vmem:[#allocation6 + $0x9a0] sm:$0xff]   ;;  %v7814_v26 = vld [vmem:[#allocation6 + $0x968] sm:$0xff]  }
 0x17f   :  { %7079 = vmatpush3.bf16.msra.mxu0 %v7776_v27  ;;  %v7815_v27 = vld [vmem:[#allocation6 + $0x9e8] sm:$0xff]  }
 0x180   :  { %7080 = vmatprep.subr.bf16.mxu0 %v7778_v28  ;;  %7101 = vmatpush3.bf16.msra.mxu1 %v7777_v29  ;;  %v7816_v28 = vld [vmem:[#allocation6 + $0x928] sm:$0xff]  }
 0x181   :  { %7102 = vmatprep.subr.bf16.mxu1 %v7779_v30  ;;  %v7817_v30 = vld [vmem:[#allocation6 + $0x9a8] sm:$0xff]  }
 0x183   :  { %7081 = vmatpush3.bf16.msra.mxu0 %v7780_v31 }
 0x184   :  { %7082 = vmatprep.subr.bf16.mxu0 %v7782_v32  ;;  %7103 = vmatpush3.bf16.msra.mxu1 %v7781_v33  ;;  %v7818_v32 = vld [vmem:[#allocation6 + $0x970] sm:$0xff]  }
 0x185   :  { %v6780_v37 = vpop.f32.mrb[4].mxu0  ;;  %7104 = vmatprep.subr.bf16.mxu1 %v7783_v34 }
 0x186   :  { %v6781_v39 = vpop.f32.mrb[5].mxu0  ;;  %v6802_v41 = vpop.f32.mrb[4].mxu1 }
 0x187   :  { %v6782_v42 = vadd.f32 %v6781_v39, %v6780_v37  ;;  %v6783_v43 = vpop.f32.mrb[6].mxu0  ;;  %v6803_v46 = vpop.f32.mrb[5].mxu1  ;;  %7083 = vmatpush3.bf16.msra.mxu0 %v7784_v36  ;;  %v7819_v37 = vld [vmem:[#allocation6 + $0x9f0] sm:$0xff]  }
 0x188   :  { %v6784_v47 = vpop.f32.mrb[7].mxu0  ;;  %v6804_v50 = vadd.f32 %v6803_v46, %v6802_v41  ;;  %v6805_v51 = vpop.f32.mrb[6].mxu1  ;;  %7084 = vmatprep.subr.bf16.mxu0 %v7786_v38  ;;  %7105 = vmatpush3.bf16.msra.mxu1 %v7785_v40  ;;  %v7820_v38 = vld [vmem:[#allocation6 + $0x930] sm:$0xff]   ;;  %v7822_v46 = vld [vmem:[#allocation6 + $0x978] sm:$0xff]  }
 0x189   :  { %v4791_v49 = vadd.f32 %v6782_v42, %v8369_v7  ;;  %v6806_v53 = vpop.f32.mrb[7].mxu1  ;;  %7106 = vmatprep.subr.bf16.mxu1 %v7787_v44  ;;  %v7798_v7 = vld [vmem:[#allocation6 + $0x948] sm:$0xff]   ;;  %v7821_v44 = vld [vmem:[#allocation6 + $0x9b0] sm:$0xff]   ;;  %v1374_v51 = vrot.slane %v8379_v1, %v8325_v35  ;;  %v7839_v1 = vld [vmem:[#allocation6 + $0xa58] sm:$0xff]  }
 0x18a   :  { %v7828_v53 = vld [vmem:[#allocation6 + $0xac0] sm:$0xff]  }
 0x18b   :  { %v8374_v55 = vadd.f32 %v6804_v50, %v4791_v49  ;;  %7085 = vmatpush3.bf16.msra.mxu0 %v7788_v45  ;;  %v7824_v49 = vld [vmem:[#allocation6 + $0x938] sm:$0xff]  }
 0x18c   :  { %7086 = vmatprep.subr.bf16.mxu0 %v7790_v52  ;;  %7107 = vmatpush3.bf16.msra.mxu1 %v7789_v48  ;;  %v7823_v48 = vld [vmem:[#allocation6 + $0x9f8] sm:$0xff]   ;;  %v7827_v52 = vld [vmem:[#allocation6 + $0xa40] sm:$0xff]  }
 0x18d   :  { %7108 = vmatprep.subr.bf16.mxu1 %v7791_v54  ;;  %v7825_v50 = vld [vmem:[#allocation6 + $0x9b8] sm:$0xff]   ;;  %v7829_v54 = vld [vmem:[#allocation6 + $0xa00] sm:$0xff]  }
 0x18f   :  { %7087 = vmatpush3.bf16.msra.mxu0 %v7792_v56  ;;  %v1390_v56 = vcombine.high %v1374_v51, %v1374_v51 }
 0x190   :  { %7116 = vmatprep.subr.bf16.mxu0 %v7794_v59  ;;  %7109 = vmatpush3.bf16.msra.mxu1 %v7793_v61  ;;  %v7833_v59 = vld [vmem:[#allocation6 + $0xa08] sm:$0xff]   ;;  %v7835_v61 = vld [vmem:[#allocation6 + $0xa50] sm:$0xff]  }
 0x191   :  { %7138 = vmatprep.subr.bf16.mxu1 %v7795_v0  ;;  %v7838_v0 = vld [vmem:[#allocation6 + $0xa90] sm:$0xff]  }
 0x192   :  { %5349 = vmatmul.mubr.bf16.vlgmr.msra.gmra.mrb[32].mxu0 %v1367_v63  ;;  %v7837_v63 = vld [vmem:[#allocation6 + $0xa10] sm:$0xff]  }
 0x193   :  { %7117 = vmatpush3.bf16.msra.mxu0 %v7796_v2  ;;  %5389 = vmatmul.mubr.bf16.vlgmr.msra.gmra.mrb[32].mxu1 %v1389_v6  ;;  %v7840_v2 = vld [vmem:[#allocation6 + $0xad8] sm:$0xff]   ;;  %v7844_v6 = vld [vmem:[#allocation6 + $0xae0] sm:$0xff]  }
 0x194   :  { %7118 = vmatprep.subr.bf16.mxu0 %v7798_v7  ;;  %7139 = vmatpush3.bf16.msra.mxu1 %v7797_v4  ;;  %v7842_v4 = vld [vmem:[#allocation6 + $0xa98] sm:$0xff]   ;;  %v7845_v7 = vld [vmem:[#allocation6 + $0xa20] sm:$0xff]  }
 0x195   :  { %5428 = vmatprep.mubr.bf16.mxu0 %v1388_v10  ;;  %7140 = vmatprep.subr.bf16.mxu1 %v7799_v9  ;;  %v7847_v9 = vld [vmem:[#allocation6 + $0xa68] sm:$0xff]  }
 0x196   :  { %5468 = vmatprep.mubr.bf16.mxu1 %v1392_v13  ;;  %v7848_v10 = vld [vmem:[#allocation6 + $0xae8] sm:$0xff]  }
 0x197   :  { %7119 = vmatpush3.bf16.msra.mxu0 %v7800_v11  ;;  %v7849_v11 = vld [vmem:[#allocation6 + $0xa28] sm:$0xff]  }
 0x198   :  { %7120 = vmatprep.subr.bf16.mxu0 %v7802_v14  ;;  %7141 = vmatpush3.bf16.msra.mxu1 %v7801_v12  ;;  %v7850_v13 = vld [vmem:[#allocation6 + $0xaa8] sm:$0xff]  }
 0x199   :  { %7142 = vmatprep.subr.bf16.mxu1 %v7803_v15  ;;  %v7851_v15 = vld [vmem:[#allocation6 + $0xa70] sm:$0xff]  }
 0x19b   :  { %7121 = vmatpush3.bf16.msra.mxu0 %v7804_v16 }
 0x19c   :  { %7122 = vmatprep.subr.bf16.mxu0 %v7806_v18  ;;  %7143 = vmatpush3.bf16.msra.mxu1 %v7805_v17 }
 0x19d   :  { %7144 = vmatprep.subr.bf16.mxu1 %v7807_v19  ;;  %v7852_v19 = vld [vmem:[#allocation6 + $0xaf0] sm:$0xff]  }
 0x19f   :  { %7123 = vmatpush3.bf16.msra.mxu0 %v7808_v20  ;;  %v7853_v20 = vld [vmem:[#allocation6 + $0xa30] sm:$0xff]  }
 0x1a0   :  { %7124 = vmatprep.subr.bf16.mxu0 %v7810_v22  ;;  %7145 = vmatpush3.bf16.msra.mxu1 %v7809_v21 }
 0x1a1   :  { %7146 = vmatprep.subr.bf16.mxu1 %v7811_v23 }
 0x1a3   :  { %7125 = vmatpush3.bf16.msra.mxu0 %v7812_v24 }
 0x1a4   :  { %7126 = vmatprep.subr.bf16.mxu0 %v7814_v26  ;;  %7147 = vmatpush3.bf16.msra.mxu1 %v7813_v25  ;;  %v7854_v26 = vld [vmem:[#allocation6 + $0xab0] sm:$0xff]  }
 0x1a5   :  { %v6824_v29 = vpop.f32.mrb[8].mxu0  ;;  %7148 = vmatprep.subr.bf16.mxu1 %v7815_v27 }
 0x1a6   :  { %v6825_v31 = vpop.f32.mrb[9].mxu0  ;;  %v6846_v33 = vpop.f32.mrb[8].mxu1 }
 0x1a7   :  { %v6826_v34 = vadd.f32 %v6825_v31, %v6824_v29  ;;  %v6827_v36 = vpop.f32.mrb[10].mxu0  ;;  %v6847_v39 = vpop.f32.mrb[9].mxu1  ;;  %7127 = vmatpush3.bf16.msra.mxu0 %v7816_v28  ;;  %v7855_v28 = vld [vmem:[#allocation6 + $0xa78] sm:$0xff]  }
 0x1a8   :  { %v6828_v40 = vpop.f32.mrb[11].mxu0  ;;  %v6848_v42 = vadd.f32 %v6847_v39, %v6846_v33  ;;  %v6849_v43 = vpop.f32.mrb[10].mxu1  ;;  %7128 = vmatprep.subr.bf16.mxu0 %v7818_v32  ;;  %7149 = vmatpush3.bf16.msra.mxu1 %v7817_v30  ;;  %v7856_v30 = vld [vmem:[#allocation6 + $0xaf8] sm:$0xff]   ;;  %v113_v32 = vld [vmem:[#allocation3 + $0x28] sm:$0xff] }
 0x1a9   :  { %v4871_v41 = vadd.f32 %v6826_v34, %v8374_v55  ;;  %v6850_v45 = vpop.f32.mrb[11].mxu1  ;;  %7150 = vmatprep.subr.bf16.mxu1 %v7819_v37  ;;  %v7830_v55 = vld [vmem:[#allocation6 + $0xa80] sm:$0xff]   ;;  %v7857_v31 = vld [vmem:[#allocation6 + $0xa38] sm:$0xff]   ;;  %v1400_v33 = vrot.slane %v113_v32, %v8325_v35  ;;  %v1393_v36 = vcombine.high %v113_v32, %v113_v32  ;;  %v7896_v32 = vld [vmem:[#allocation6 + $0xc48] sm:$0xff]  }
 0x1aa   :  { %v7859_v34 = vld [vmem:[#allocation6 + $0xb40] sm:$0xff]   ;;  %v7858_v37 = vld [vmem:[#allocation6 + $0xab8] sm:$0xff]  }
 0x1ab   :  { %v8386_v47 = vadd.f32 %v6848_v42, %v4871_v41  ;;  %7129 = vmatpush3.bf16.msra.mxu0 %v7820_v38  ;;  %v1408_v38 = vcombine.high %v1400_v33, %v1400_v33  ;;  %v1416_v39 = vrot.slane %v1400_v33, %v8325_v35  ;;  %v7860_v40 = vld [vmem:[#allocation6 + $0xbc0] sm:$0xff]   ;;  %v8396_v41 = vrot.slane %v1393_v36, %v8325_v35  ;;  %v7897_v33 = vld [vmem:[#allocation6 + $0xcc8] sm:$0xff]  }
 0x1ac   :  { %7130 = vmatprep.subr.bf16.mxu0 %v7822_v46  ;;  %7151 = vmatpush3.bf16.msra.mxu1 %v7821_v44  ;;  %v7861_v42 = vld [vmem:[#allocation6 + $0xb00] sm:$0xff]   ;;  %v7899_v36 = vld [vmem:[#allocation6 + $0xc88] sm:$0xff]  }
 0x1ad   :  { %7152 = vmatprep.subr.bf16.mxu1 %v7823_v48  ;;  %v1430_v43 = vrot.slane %v1408_v38, %v8325_v35  ;;  %v7862_v44 = vld [vmem:[#allocation6 + $0xb80] sm:$0xff]   ;;  %v1409_v45 = vcombine.high %v8396_v41, %v8396_v41  ;;  %v1438_v46 = vcombine.high %v1416_v39, %v1416_v39  ;;  %v7901_v38 = vld [vmem:[#allocation6 + $0xcd0] sm:$0xff]  }
 0x1af   :  { %7131 = vmatpush3.bf16.msra.mxu0 %v7824_v49  ;;  %v1440_v48 = vcombine.high %v1430_v43, %v1430_v43  ;;  %v7864_v49 = vld [vmem:[#allocation6 + $0xbc8] sm:$0xff]  }
 0x1b0   :  { %7160 = vmatprep.subr.bf16.mxu0 %v7827_v52  ;;  %7153 = vmatpush3.bf16.msra.mxu1 %v7825_v50  ;;  %v1437_v50 = vrot.slane %v1409_v45, %v8325_v35  ;;  %v7866_v52 = vld [vmem:[#allocation6 + $0xb88] sm:$0xff]   ;;  %v7908_v45 = vld [vmem:[#allocation6 + $0xc60] sm:$0xff]  }
 0x1b1   :  { %7182 = vmatprep.subr.bf16.mxu1 %v7828_v53 }
 0x1b2   :  { %5429 = vmatmul.mubr.bf16.vlgmr.msra.gmra.mrb[36].mxu0 %v1374_v51  ;;  %v7865_v51 = vld [vmem:[#allocation6 + $0xb08] sm:$0xff]   ;;  %v1441_v53 = vcombine.high %v1437_v50, %v1437_v50 }
 0x1b3   :  { %7161 = vmatpush3.bf16.msra.mxu0 %v7829_v54  ;;  %5469 = vmatmul.mubr.bf16.vlgmr.msra.gmra.mrb[36].mxu1 %v1390_v56  ;;  %v7867_v54 = vld [vmem:[#allocation6 + $0xb50] sm:$0xff]  }
 0x1b4   :  { %7162 = vmatprep.subr.bf16.mxu0 %v7831_v57  ;;  %7183 = vmatpush3.bf16.msra.mxu1 %v7830_v55  ;;  %v7868_v55 = vld [vmem:[#allocation6 + $0xbd0] sm:$0xff]  }
 0x1b5   :  { %7184 = vmatprep.subr.bf16.mxu1 %v7832_v58  ;;  %5508 = vmatprep.mubr.bf16.mxu0 %v1430_v43  ;;  %v7869_v56 = vld [vmem:[#allocation6 + $0xb10] sm:$0xff]   ;;  %v7871_v58 = vld [vmem:[#allocation6 + $0xb58] sm:$0xff]  }
 0x1b6   :  { %5548 = vmatprep.mubr.bf16.mxu1 %v1440_v48  ;;  %v7870_v57 = vld [vmem:[#allocation6 + $0xb90] sm:$0xff]   ;;  %v7906_v43 = vld [vmem:[#allocation6 + $0xc18] sm:$0xff]   ;;  %v7911_v48 = vld [vmem:[#allocation6 + $0xca0] sm:$0xff]  }
 0x1b7   :  { %7163 = vmatpush3.bf16.msra.mxu0 %v7833_v59  ;;  %v7872_v59 = vld [vmem:[#allocation6 + $0xbd8] sm:$0xff]  }
 0x1b8   :  { %7164 = vmatprep.subr.bf16.mxu0 %v7835_v61  ;;  %7185 = vmatpush3.bf16.msra.mxu1 %v7834_v60  ;;  %v7873_v60 = vld [vmem:[#allocation6 + $0xb18] sm:$0xff]  }
 0x1b9   :  { %7186 = vmatprep.subr.bf16.mxu1 %v7836_v62  ;;  %v7874_v61 = vld [vmem:[#allocation6 + $0xb98] sm:$0xff]   ;;  %v7875_v62 = vld [vmem:[#allocation6 + $0xb60] sm:$0xff]  }
 0x1bb   :  { %7165 = vmatpush3.bf16.msra.mxu0 %v7837_v63  ;;  %v7876_v63 = vld [vmem:[#allocation6 + $0xbe0] sm:$0xff]  }
 0x1bc   :  { %7166 = vmatprep.subr.bf16.mxu0 %v7839_v1  ;;  %7187 = vmatpush3.bf16.msra.mxu1 %v7838_v0  ;;  %v7877_v0 = vld [vmem:[#allocation6 + $0xb20] sm:$0xff]  }
 0x1bd   :  { %7188 = vmatprep.subr.bf16.mxu1 %v7840_v2  ;;  %v7878_v1 = vld [vmem:[#allocation6 + $0xba0] sm:$0xff]   ;;  %v7879_v2 = vld [vmem:[#allocation6 + $0xb68] sm:$0xff]  }
 0x1bf   :  { %7167 = vmatpush3.bf16.msra.mxu0 %v7841_v3  ;;  %v7880_v3 = vld [vmem:[#allocation6 + $0xbe8] sm:$0xff]  }
 0x1c0   :  { %7168 = vmatprep.subr.bf16.mxu0 %v7843_v5  ;;  %7189 = vmatpush3.bf16.msra.mxu1 %v7842_v4  ;;  %v7881_v5 = vld [vmem:[#allocation6 + $0xb28] sm:$0xff]  }
 0x1c1   :  { %7190 = vmatprep.subr.bf16.mxu1 %v7844_v6 }
 0x1c3   :  { %7169 = vmatpush3.bf16.msra.mxu0 %v7845_v7  ;;  %v7882_v7 = vld [vmem:[#allocation6 + $0xba8] sm:$0xff]  }
 0x1c4   :  { %7170 = vmatprep.subr.bf16.mxu0 %v7847_v9  ;;  %7191 = vmatpush3.bf16.msra.mxu1 %v7846_v8 }
 0x1c5   :  { %v6868_v12 = vpop.f32.mrb[12].mxu0  ;;  %7192 = vmatprep.subr.bf16.mxu1 %v7848_v10 }
 0x1c6   :  { %v6869_v14 = vpop.f32.mrb[13].mxu0  ;;  %v6890_v16 = vpop.f32.mrb[12].mxu1 }
 0x1c7   :  { %v6870_v17 = vadd.f32 %v6869_v14, %v6868_v12  ;;  %v6871_v18 = vpop.f32.mrb[14].mxu0  ;;  %v6891_v21 = vpop.f32.mrb[13].mxu1  ;;  %7171 = vmatpush3.bf16.msra.mxu0 %v7849_v11  ;;  %v7883_v11 = vld [vmem:[#allocation6 + $0xb70] sm:$0xff]  }
 0x1c8   :  { %v6872_v22 = vpop.f32.mrb[15].mxu0  ;;  %v6892_v24 = vadd.f32 %v6891_v21, %v6890_v16  ;;  %v6893_v25 = vpop.f32.mrb[14].mxu1  ;;  %7172 = vmatprep.subr.bf16.mxu0 %v7851_v15  ;;  %7193 = vmatpush3.bf16.msra.mxu1 %v7850_v13  ;;  %v7884_v12 = vld [vmem:[#allocation6 + $0xbf0] sm:$0xff]  }
 0x1c9   :  { %v4951_v23 = vadd.f32 %v6870_v17, %v8386_v47  ;;  %v6894_v27 = vpop.f32.mrb[15].mxu1  ;;  %7194 = vmatprep.subr.bf16.mxu1 %v7852_v19  ;;  %v7863_v47 = vld [vmem:[#allocation6 + $0xb48] sm:$0xff]   ;;  %v7885_v18 = vld [vmem:[#allocation6 + $0xb30] sm:$0xff]   ;;  %v7887_v22 = vld [vmem:[#allocation6 + $0xb78] sm:$0xff]  }
 0x1ca   :  { %v7890_v25 = vld [vmem:[#allocation6 + $0xbb8] sm:$0xff]   ;;  %v7892_v27 = vld [vmem:[#allocation6 + $0xc40] sm:$0xff]  }
 0x1cb   :  { %v8391_v29 = vadd.f32 %v6892_v24, %v4951_v23  ;;  %7173 = vmatpush3.bf16.msra.mxu0 %v7853_v20  ;;  %v7886_v20 = vld [vmem:[#allocation6 + $0xbb0] sm:$0xff]   ;;  %v7888_v23 = vld [vmem:[#allocation6 + $0xbf8] sm:$0xff]  }
 0x1cc   :  { %7174 = vmatprep.subr.bf16.mxu0 %v7855_v28  ;;  %7195 = vmatpush3.bf16.msra.mxu1 %v7854_v26  ;;  %v7889_v24 = vld [vmem:[#allocation6 + $0xb38] sm:$0xff]   ;;  %v1423_v26 = vrot.slane %v8396_v41, %v8325_v35  ;;  %v7893_v28 = vld [vmem:[#allocation6 + $0xcc0] sm:$0xff]  }
 0x1cd   :  { %7196 = vmatprep.subr.bf16.mxu1 %v7856_v30  ;;  %v7895_v30 = vld [vmem:[#allocation6 + $0xc80] sm:$0xff]   ;;  %v7904_v41 = vld [vmem:[#allocation6 + $0xc58] sm:$0xff]  }
 0x1cf   :  { %7175 = vmatpush3.bf16.msra.mxu0 %v7857_v31  ;;  %v1439_v31 = vcombine.high %v1423_v26, %v1423_v26 }
 0x1d0   :  { %7204 = vmatprep.subr.bf16.mxu0 %v7859_v34  ;;  %7197 = vmatpush3.bf16.msra.mxu1 %v7858_v37  ;;  %v7898_v34 = vld [vmem:[#allocation6 + $0xc08] sm:$0xff]   ;;  %v7900_v37 = vld [vmem:[#allocation6 + $0xc50] sm:$0xff]  }
 0x1d1   :  { %7226 = vmatprep.subr.bf16.mxu1 %v7860_v40  ;;  %v7903_v40 = vld [vmem:[#allocation6 + $0xc90] sm:$0xff]  }
 0x1d2   :  { %5509 = vmatmul.mubr.bf16.vlgmr.msra.gmra.mrb[40].mxu0 %v1416_v39  ;;  %v7902_v39 = vld [vmem:[#allocation6 + $0xc10] sm:$0xff]  }
 0x1d3   :  { %7205 = vmatpush3.bf16.msra.mxu0 %v7861_v42  ;;  %5549 = vmatmul.mubr.bf16.vlgmr.msra.gmra.mrb[40].mxu1 %v1438_v46  ;;  %v7905_v42 = vld [vmem:[#allocation6 + $0xcd8] sm:$0xff]   ;;  %v7909_v46 = vld [vmem:[#allocation6 + $0xce0] sm:$0xff]  }
 0x1d4   :  { %7206 = vmatprep.subr.bf16.mxu0 %v7863_v47  ;;  %7227 = vmatpush3.bf16.msra.mxu1 %v7862_v44  ;;  %v7907_v44 = vld [vmem:[#allocation6 + $0xc98] sm:$0xff]   ;;  %v7910_v47 = vld [vmem:[#allocation6 + $0xc20] sm:$0xff]  }
 0x1d5   :  { %5588 = vmatprep.mubr.bf16.mxu0 %v1437_v50  ;;  %7228 = vmatprep.subr.bf16.mxu1 %v7864_v49  ;;  %v7912_v49 = vld [vmem:[#allocation6 + $0xc68] sm:$0xff]  }
 0x1d6   :  { %5628 = vmatprep.mubr.bf16.mxu1 %v1441_v53  ;;  %v7913_v50 = vld [vmem:[#allocation6 + $0xce8] sm:$0xff]  }
 0x1d7   :  { %7207 = vmatpush3.bf16.msra.mxu0 %v7865_v51 }
 0x1d8   :  { %7208 = vmatprep.subr.bf16.mxu0 %v7867_v54  ;;  %7229 = vmatpush3.bf16.msra.mxu1 %v7866_v52  ;;  %v7914_v52 = vld [vmem:[#allocation6 + $0xc28] sm:$0xff]  }
 0x1d9   :  { %7230 = vmatprep.subr.bf16.mxu1 %v7868_v55  ;;  %v7915_v54 = vld [vmem:[#allocation6 + $0xca8] sm:$0xff]  }
 0x1db   :  { %7209 = vmatpush3.bf16.msra.mxu0 %v7869_v56 }
 0x1dc   :  { %7210 = vmatprep.subr.bf16.mxu0 %v7871_v58  ;;  %7231 = vmatpush3.bf16.msra.mxu1 %v7870_v57  ;;  %v7916_v58 = vld [vmem:[#allocation6 + $0xc70] sm:$0xff]  }
 0x1dd   :  { %7232 = vmatprep.subr.bf16.mxu1 %v7872_v59  ;;  %v7917_v59 = vld [vmem:[#allocation6 + $0xcf0] sm:$0xff]  }
 0x1df   :  { %7211 = vmatpush3.bf16.msra.mxu0 %v7873_v60 }
 0x1e0   :  { %7212 = vmatprep.subr.bf16.mxu0 %v7875_v62  ;;  %7233 = vmatpush3.bf16.msra.mxu1 %v7874_v61 }
 0x1e1   :  { %7234 = vmatprep.subr.bf16.mxu1 %v7876_v63 }
 0x1e3   :  { %7213 = vmatpush3.bf16.msra.mxu0 %v7877_v0 }
 0x1e4   :  { %7214 = vmatprep.subr.bf16.mxu0 %v7879_v2  ;;  %7235 = vmatpush3.bf16.msra.mxu1 %v7878_v1  ;;  %v7918_v1 = vld [vmem:[#allocation6 + $0xc30] sm:$0xff]  }
 0x1e5   :  { %v6912_v4 = vpop.f32.mrb[16].mxu0  ;;  %7236 = vmatprep.subr.bf16.mxu1 %v7880_v3  ;;  %v7919_v3 = vld [vmem:[#allocation6 + $0xcb0] sm:$0xff]  }
 0x1e6   :  { %v6913_v6 = vpop.f32.mrb[17].mxu0  ;;  %v6934_v8 = vpop.f32.mrb[16].mxu1 }
 0x1e7   :  { %v6914_v9 = vadd.f32 %v6913_v6, %v6912_v4  ;;  %v6915_v10 = vpop.f32.mrb[18].mxu0  ;;  %v6935_v13 = vpop.f32.mrb[17].mxu1  ;;  %7215 = vmatpush3.bf16.msra.mxu0 %v7881_v5  ;;  %v7920_v5 = vld [vmem:[#allocation6 + $0xc78] sm:$0xff]  }
 0x1e8   :  { %v6916_v14 = vpop.f32.mrb[19].mxu0  ;;  %v6936_v16 = vadd.f32 %v6935_v13, %v6934_v8  ;;  %v6937_v17 = vpop.f32.mrb[18].mxu1  ;;  %7216 = vmatprep.subr.bf16.mxu0 %v7883_v11  ;;  %7237 = vmatpush3.bf16.msra.mxu1 %v7882_v7  ;;  %v7921_v6 = vld [vmem:[#allocation6 + $0xcf8] sm:$0xff]   ;;  %v114_v8 = vld [vmem:[#allocation3 + $0x30] sm:$0xff]  ;;  %v7924_v10 = vld [vmem:[#allocation6 + $0xd40] sm:$0xff]  }
 0x1e9   :  { %v5031_v15 = vadd.f32 %v6914_v9, %v8391_v29  ;;  %v6938_v19 = vpop.f32.mrb[19].mxu1  ;;  %7238 = vmatprep.subr.bf16.mxu1 %v7884_v12  ;;  %v7894_v29 = vld [vmem:[#allocation6 + $0xc00] sm:$0xff]   ;;  %v7922_v7 = vld [vmem:[#allocation6 + $0xc38] sm:$0xff]   ;;  %v1449_v9 = vrot.slane %v114_v8, %v8325_v35  ;;  %v1442_v11 = vcombine.high %v114_v8, %v114_v8  ;;  %v7961_v8 = vld [vmem:[#allocation6 + $0xe48] sm:$0xff]  }
 0x1ea   :  { %v7923_v12 = vld [vmem:[#allocation6 + $0xcb8] sm:$0xff]   ;;  %v7926_v17 = vld [vmem:[#allocation6 + $0xd00] sm:$0xff]  }
 0x1eb   :  { %v8403_v21 = vadd.f32 %v6936_v16, %v5031_v15  ;;  %7217 = vmatpush3.bf16.msra.mxu0 %v7885_v18  ;;  %v1457_v13 = vcombine.high %v1449_v9, %v1449_v9  ;;  %v1465_v14 = vrot.slane %v1449_v9, %v8325_v35  ;;  %v7925_v15 = vld [vmem:[#allocation6 + $0xdc0] sm:$0xff]   ;;  %v8413_v16 = vrot.slane %v1442_v11, %v8325_v35  ;;  %v7962_v9 = vld [vmem:[#allocation6 + $0xec8] sm:$0xff]  }
 0x1ec   :  { %7218 = vmatprep.subr.bf16.mxu0 %v7887_v22  ;;  %7239 = vmatpush3.bf16.msra.mxu1 %v7886_v20  ;;  %v7927_v19 = vld [vmem:[#allocation6 + $0xd80] sm:$0xff]   ;;  %v7928_v22 = vld [vmem:[#allocation6 + $0xd48] sm:$0xff]  }
 0x1ed   :  { %7240 = vmatprep.subr.bf16.mxu1 %v7888_v23  ;;  %v1479_v18 = vrot.slane %v1457_v13, %v8325_v35  ;;  %v1458_v20 = vcombine.high %v8413_v16, %v8413_v16  ;;  %v7964_v11 = vld [vmem:[#allocation6 + $0xe88] sm:$0xff]   ;;  %v7966_v13 = vld [vmem:[#allocation6 + $0xed0] sm:$0xff]  }
 0x1ef   :  { %7219 = vmatpush3.bf16.msra.mxu0 %v7889_v24  ;;  %v1489_v23 = vcombine.high %v1479_v18, %v1479_v18  ;;  %v7929_v24 = vld [vmem:[#allocation6 + $0xdc8] sm:$0xff]  }
 0x1f0   :  { %7248 = vmatprep.subr.bf16.mxu0 %v7892_v27  ;;  %7241 = vmatpush3.bf16.msra.mxu1 %v7890_v25  ;;  %v1486_v25 = vrot.slane %v1458_v20, %v8325_v35  ;;  %v7931_v27 = vld [vmem:[#allocation6 + $0xd88] sm:$0xff]   ;;  %v7973_v20 = vld [vmem:[#allocation6 + $0xe60] sm:$0xff]  }
 0x1f1   :  { %7270 = vmatprep.subr.bf16.mxu1 %v7893_v28 }
 0x1f2   :  { %5589 = vmatmul.mubr.bf16.vlgmr.msra.gmra.mrb[44].mxu0 %v1423_v26  ;;  %v7930_v26 = vld [vmem:[#allocation6 + $0xd08] sm:$0xff]   ;;  %v1490_v28 = vcombine.high %v1486_v25, %v1486_v25 }
 0x1f3   :  { %7249 = vmatpush3.bf16.msra.mxu0 %v7894_v29  ;;  %5629 = vmatmul.mubr.bf16.vlgmr.msra.gmra.mrb[44].mxu1 %v1439_v31  ;;  %v7932_v29 = vld [vmem:[#allocation6 + $0xd50] sm:$0xff]  }
 0x1f4   :  { %7250 = vmatprep.subr.bf16.mxu0 %v7896_v32  ;;  %7271 = vmatpush3.bf16.msra.mxu1 %v7895_v30  ;;  %v7933_v30 = vld [vmem:[#allocation6 + $0xdd0] sm:$0xff]  }
 0x1f5   :  { %7272 = vmatprep.subr.bf16.mxu1 %v7897_v33  ;;  %5668 = vmatprep.mubr.bf16.mxu0 %v1479_v18  ;;  %v7934_v31 = vld [vmem:[#allocation6 + $0xd10] sm:$0xff]   ;;  %v7936_v33 = vld [vmem:[#allocation6 + $0xd58] sm:$0xff]  }
 0x1f6   :  { %5708 = vmatprep.mubr.bf16.mxu1 %v1489_v23  ;;  %v7935_v32 = vld [vmem:[#allocation6 + $0xd90] sm:$0xff]   ;;  %v7971_v18 = vld [vmem:[#allocation6 + $0xe18] sm:$0xff]   ;;  %v7976_v23 = vld [vmem:[#allocation6 + $0xea0] sm:$0xff]  }
 0x1f7   :  { %7251 = vmatpush3.bf16.msra.mxu0 %v7898_v34  ;;  %v7937_v34 = vld [vmem:[#allocation6 + $0xdd8] sm:$0xff]  }
 0x1f8   :  { %7252 = vmatprep.subr.bf16.mxu0 %v7900_v37  ;;  %7273 = vmatpush3.bf16.msra.mxu1 %v7899_v36  ;;  %v7938_v36 = vld [vmem:[#allocation6 + $0xd18] sm:$0xff]  }
 0x1f9   :  { %7274 = vmatprep.subr.bf16.mxu1 %v7901_v38  ;;  %v7939_v37 = vld [vmem:[#allocation6 + $0xd98] sm:$0xff]   ;;  %v7940_v38 = vld [vmem:[#allocation6 + $0xd60] sm:$0xff]  }
 0x1fb   :  { %7253 = vmatpush3.bf16.msra.mxu0 %v7902_v39  ;;  %v7941_v39 = vld [vmem:[#allocation6 + $0xde0] sm:$0xff]  }
 0x1fc   :  { %7254 = vmatprep.subr.bf16.mxu0 %v7904_v41  ;;  %7275 = vmatpush3.bf16.msra.mxu1 %v7903_v40  ;;  %v7942_v40 = vld [vmem:[#allocation6 + $0xd20] sm:$0xff]  }
 0x1fd   :  { %7276 = vmatprep.subr.bf16.mxu1 %v7905_v42  ;;  %v7943_v41 = vld [vmem:[#allocation6 + $0xda0] sm:$0xff]   ;;  %v7944_v42 = vld [vmem:[#allocation6 + $0xd68] sm:$0xff]  }
 0x1ff   :  { %7255 = vmatpush3.bf16.msra.mxu0 %v7906_v43  ;;  %v7945_v43 = vld [vmem:[#allocation6 + $0xde8] sm:$0xff]  }
 0x200   :  { %7256 = vmatprep.subr.bf16.mxu0 %v7908_v45  ;;  %7277 = vmatpush3.bf16.msra.mxu1 %v7907_v44  ;;  %v7946_v45 = vld [vmem:[#allocation6 + $0xd28] sm:$0xff]  }
 0x201   :  { %7278 = vmatprep.subr.bf16.mxu1 %v7909_v46 }
 0x203   :  { %7257 = vmatpush3.bf16.msra.mxu0 %v7910_v47  ;;  %v7947_v47 = vld [vmem:[#allocation6 + $0xda8] sm:$0xff]  }
 0x204   :  { %7258 = vmatprep.subr.bf16.mxu0 %v7912_v49  ;;  %7279 = vmatpush3.bf16.msra.mxu1 %v7911_v48 }
 0x205   :  { %v6956_v51 = vpop.f32.mrb[20].mxu0  ;;  %7280 = vmatprep.subr.bf16.mxu1 %v7913_v50 }
 0x206   :  { %v6957_v53 = vpop.f32.mrb[21].mxu0  ;;  %v6978_v55 = vpop.f32.mrb[20].mxu1 }
 0x207   :  { %v6958_v56 = vadd.f32 %v6957_v53, %v6956_v51  ;;  %v6959_v57 = vpop.f32.mrb[22].mxu0  ;;  %v6979_v60 = vpop.f32.mrb[21].mxu1  ;;  %7259 = vmatpush3.bf16.msra.mxu0 %v7914_v52  ;;  %v7948_v51 = vld [vmem:[#allocation6 + $0xd70] sm:$0xff]  }
 0x208   :  { %v6960_v61 = vpop.f32.mrb[23].mxu0  ;;  %v6980_v63 = vadd.f32 %v6979_v60, %v6978_v55  ;;  %v6981_v0 = vpop.f32.mrb[22].mxu1  ;;  %7260 = vmatprep.subr.bf16.mxu0 %v7916_v58  ;;  %7281 = vmatpush3.bf16.msra.mxu1 %v7915_v54  ;;  %v7949_v52 = vld [vmem:[#allocation6 + $0xdf0] sm:$0xff]  }
 0x209   :  { %v5111_v62 = vadd.f32 %v6958_v56, %v8403_v21  ;;  %v6982_v2 = vpop.f32.mrb[23].mxu1  ;;  %7282 = vmatprep.subr.bf16.mxu1 %v7917_v59  ;;  %v1487_v21 = vcombine.high %v1465_v14, %v1465_v14  ;;  %v7950_v58 = vld [vmem:[#allocation6 + $0xd30] sm:$0xff]   ;;  %v7954_v0 = vld [vmem:[#allocation6 + $0xd38] sm:$0xff]  }
 0x20a   :  { %v7951_v60 = vld [vmem:[#allocation6 + $0xdb0] sm:$0xff]   ;;  %v1472_v2 = vrot.slane %v8413_v16, %v8325_v35  ;;  %v7969_v16 = vld [vmem:[#allocation6 + $0xe58] sm:$0xff]  }
 0x20b   :  { %v8408_v4 = vadd.f32 %v6980_v63, %v5111_v62  ;;  %7261 = vmatpush3.bf16.msra.mxu0 %v7918_v1  ;;  %v7952_v62 = vld [vmem:[#allocation6 + $0xd78] sm:$0xff]  }
 0x20c   :  { %7262 = vmatprep.subr.bf16.mxu0 %v7920_v5  ;;  %7283 = vmatpush3.bf16.msra.mxu1 %v7919_v3  ;;  %v7953_v63 = vld [vmem:[#allocation6 + $0xdf8] sm:$0xff]   ;;  %v7957_v3 = vld [vmem:[#allocation6 + $0xe40] sm:$0xff]  }
 0x20d   :  { %7284 = vmatprep.subr.bf16.mxu1 %v7921_v6  ;;  %v7955_v1 = vld [vmem:[#allocation6 + $0xdb8] sm:$0xff]   ;;  %v7959_v5 = vld [vmem:[#allocation6 + $0xe00] sm:$0xff]  }
 0x20e   :  { %v7960_v6 = vld [vmem:[#allocation6 + $0xe80] sm:$0xff]  }
 0x20f   :  { %7263 = vmatpush3.bf16.msra.mxu0 %v7922_v7  ;;  %v1488_v7 = vcombine.high %v1472_v2, %v1472_v2 }
 0x210   :  { %7292 = vmatprep.subr.bf16.mxu0 %v7924_v10  ;;  %7285 = vmatpush3.bf16.msra.mxu1 %v7923_v12  ;;  %v7963_v10 = vld [vmem:[#allocation6 + $0xe08] sm:$0xff]   ;;  %v7965_v12 = vld [vmem:[#allocation6 + $0xe50] sm:$0xff]  }
 0x211   :  { %7314 = vmatprep.subr.bf16.mxu1 %v7925_v15  ;;  %v7968_v15 = vld [vmem:[#allocation6 + $0xe90] sm:$0xff]  }
 0x212   :  { %5669 = vmatmul.mubr.bf16.vlgmr.msra.gmra.mrb[48].mxu0 %v1465_v14  ;;  %v7967_v14 = vld [vmem:[#allocation6 + $0xe10] sm:$0xff]  }
 0x213   :  { %7293 = vmatpush3.bf16.msra.mxu0 %v7926_v17  ;;  %5709 = vmatmul.mubr.bf16.vlgmr.msra.gmra.mrb[48].mxu1 %v1487_v21  ;;  %v7970_v17 = vld [vmem:[#allocation6 + $0xed8] sm:$0xff]   ;;  %v7974_v21 = vld [vmem:[#allocation6 + $0xee0] sm:$0xff]  }
 0x214   :  { %7294 = vmatprep.subr.bf16.mxu0 %v7928_v22  ;;  %7315 = vmatpush3.bf16.msra.mxu1 %v7927_v19  ;;  %v7972_v19 = vld [vmem:[#allocation6 + $0xe98] sm:$0xff]   ;;  %v7975_v22 = vld [vmem:[#allocation6 + $0xe20] sm:$0xff]  }
 0x215   :  { %5748 = vmatprep.mubr.bf16.mxu0 %v1486_v25  ;;  %7316 = vmatprep.subr.bf16.mxu1 %v7929_v24  ;;  %v7977_v24 = vld [vmem:[#allocation6 + $0xe68] sm:$0xff]  }
 0x216   :  { %5788 = vmatprep.mubr.bf16.mxu1 %v1490_v28  ;;  %v7978_v25 = vld [vmem:[#allocation6 + $0xee8] sm:$0xff]  }
 0x217   :  { %7295 = vmatpush3.bf16.msra.mxu0 %v7930_v26 }
 0x218   :  { %7296 = vmatprep.subr.bf16.mxu0 %v7932_v29  ;;  %7317 = vmatpush3.bf16.msra.mxu1 %v7931_v27  ;;  %v7979_v27 = vld [vmem:[#allocation6 + $0xe28] sm:$0xff]  }
 0x219   :  { %7318 = vmatprep.subr.bf16.mxu1 %v7933_v30  ;;  %v7980_v29 = vld [vmem:[#allocation6 + $0xea8] sm:$0xff]  }
 0x21b   :  { %7297 = vmatpush3.bf16.msra.mxu0 %v7934_v31 }
 0x21c   :  { %7298 = vmatprep.subr.bf16.mxu0 %v7936_v33  ;;  %7319 = vmatpush3.bf16.msra.mxu1 %v7935_v32  ;;  %v7981_v33 = vld [vmem:[#allocation6 + $0xe70] sm:$0xff]  }
 0x21d   :  { %7320 = vmatprep.subr.bf16.mxu1 %v7937_v34  ;;  %v7982_v34 = vld [vmem:[#allocation6 + $0xef0] sm:$0xff]  }
 0x21f   :  { %7299 = vmatpush3.bf16.msra.mxu0 %v7938_v36 }
 0x220   :  { %7300 = vmatprep.subr.bf16.mxu0 %v7940_v38  ;;  %7321 = vmatpush3.bf16.msra.mxu1 %v7939_v37 }
 0x221   :  { %7322 = vmatprep.subr.bf16.mxu1 %v7941_v39 }
 0x223   :  { %7301 = vmatpush3.bf16.msra.mxu0 %v7942_v40 }
 0x224   :  { %7302 = vmatprep.subr.bf16.mxu0 %v7944_v42  ;;  %7323 = vmatpush3.bf16.msra.mxu1 %v7943_v41  ;;  %v7983_v41 = vld [vmem:[#allocation6 + $0xe30] sm:$0xff]  }
 0x225   :  { %v7000_v44 = vpop.f32.mrb[24].mxu0  ;;  %7324 = vmatprep.subr.bf16.mxu1 %v7945_v43  ;;  %v7984_v43 = vld [vmem:[#allocation6 + $0xeb0] sm:$0xff]  }
 0x226   :  { %v7001_v46 = vpop.f32.mrb[25].mxu0  ;;  %v7022_v48 = vpop.f32.mrb[24].mxu1 }
 0x227   :  { %v7002_v49 = vadd.f32 %v7001_v46, %v7000_v44  ;;  %v7003_v50 = vpop.f32.mrb[26].mxu0  ;;  %v7023_v53 = vpop.f32.mrb[25].mxu1  ;;  %7303 = vmatpush3.bf16.msra.mxu0 %v7946_v45  ;;  %v7985_v45 = vld [vmem:[#allocation6 + $0xe78] sm:$0xff]  }
 0x228   :  { %v7004_v54 = vpop.f32.mrb[27].mxu0  ;;  %v7024_v56 = vadd.f32 %v7023_v53, %v7022_v48  ;;  %v7025_v57 = vpop.f32.mrb[26].mxu1  ;;  %7304 = vmatprep.subr.bf16.mxu0 %v7948_v51  ;;  %7325 = vmatpush3.bf16.msra.mxu1 %v7947_v47  ;;  %v7986_v46 = vld [vmem:[#allocation6 + $0xef8] sm:$0xff]   ;;  %v7989_v50 = vld [vmem:[#allocation6 + $0xf40] sm:$0xff]  }
 0x229   :  { %v5191_v55 = vadd.f32 %v7002_v49, %v8408_v4  ;;  %v7026_v59 = vpop.f32.mrb[27].mxu1  ;;  %7326 = vmatprep.subr.bf16.mxu1 %v7949_v52  ;;  %v7958_v4 = vld [vmem:[#allocation6 + $0xec0] sm:$0xff]   ;;  %v7987_v47 = vld [vmem:[#allocation6 + $0xe38] sm:$0xff]  }
 0x22a   :  { %v115_v48 = vld [vmem:[#allocation3 + $0x38] sm:$0xff]  ;;  %v7991_v57 = vld [vmem:[#allocation6 + $0xf00] sm:$0xff]  }
 0x22b   :  { %v8420_v61 = vadd.f32 %v7024_v56, %v5191_v55  ;;  %7305 = vmatpush3.bf16.msra.mxu0 %v7950_v58  ;;  %v1498_v49 = vrot.slane %v115_v48, %v8325_v35  ;;  %v1491_v51 = vcombine.high %v115_v48, %v115_v48  ;;  %v7988_v52 = vld [vmem:[#allocation6 + $0xeb8] sm:$0xff]   ;;  %v7990_v55 = vld [vmem:[#allocation6 + $0xfc0] sm:$0xff]  }
 0x22c   :  { %7306 = vmatprep.subr.bf16.mxu0 %v7952_v62  ;;  %7327 = vmatpush3.bf16.msra.mxu1 %v7951_v60  ;;  %v7992_v59 = vld [vmem:[#allocation6 + $0xf80] sm:$0xff]   ;;  %v7993_v62 = vld [vmem:[#allocation6 + $0xf48] sm:$0xff]  }
 0x22d   :  { %7328 = vmatprep.subr.bf16.mxu1 %v7953_v63  ;;  %v1506_v53 = vcombine.high %v1498_v49, %v1498_v49  ;;  %v1514_v54 = vrot.slane %v1498_v49, %v8325_v35  ;;  %v8430_v56 = vrot.slane %v1491_v51, %v8325_v35 }
 0x22f   :  { %7307 = vmatpush3.bf16.msra.mxu0 %v7954_v0  ;;  %v1528_v58 = vrot.slane %v1506_v53, %v8325_v35  ;;  %v1507_v60 = vcombine.high %v8430_v56, %v8430_v56  ;;  %v7994_v0 = vld [vmem:[#allocation6 + $0xfc8] sm:$0xff]  }
 0x230   :  { %7336 = vmatprep.subr.bf16.mxu0 %v7957_v3  ;;  %7329 = vmatpush3.bf16.msra.mxu1 %v7955_v1  ;;  %v7996_v3 = vld [vmem:[#allocation6 + $0xf88] sm:$0xff]  }
 0x231   :  { %7358 = vmatprep.subr.bf16.mxu1 %v7958_v4  ;;  %v1538_v63 = vcombine.high %v1528_v58, %v1528_v58  ;;  %v1535_v1 = vrot.slane %v1507_v60, %v8325_v35 }
 0x232   :  { %5749 = vmatmul.mubr.bf16.vlgmr.msra.gmra.mrb[52].mxu0 %v1472_v2  ;;  %v7995_v2 = vld [vmem:[#allocation6 + $0xf08] sm:$0xff]  }
 0x233   :  { %7337 = vmatpush3.bf16.msra.mxu0 %v7959_v5  ;;  %5789 = vmatmul.mubr.bf16.vlgmr.msra.gmra.mrb[52].mxu1 %v1488_v7  ;;  %v1539_v4 = vcombine.high %v1535_v1, %v1535_v1  ;;  %v7997_v5 = vld [vmem:[#allocation6 + $0xf50] sm:$0xff]  }
 0x234   :  { %7338 = vmatprep.subr.bf16.mxu0 %v7961_v8  ;;  %7359 = vmatpush3.bf16.msra.mxu1 %v7960_v6  ;;  %v7998_v6 = vld [vmem:[#allocation6 + $0xfd0] sm:$0xff]  }
 0x235   :  { %7360 = vmatprep.subr.bf16.mxu1 %v7962_v9  ;;  %5828 = vmatprep.mubr.bf16.mxu0 %v1528_v58  ;;  %v7999_v7 = vld [vmem:[#allocation6 + $0xf10] sm:$0xff]   ;;  %v8001_v9 = vld [vmem:[#allocation6 + $0xf58] sm:$0xff]  }
 0x236   :  { %5868 = vmatprep.mubr.bf16.mxu1 %v1538_v63  ;;  %v8000_v8 = vld [vmem:[#allocation6 + $0xf90] sm:$0xff]  }
 0x237   :  { %7339 = vmatpush3.bf16.msra.mxu0 %v7963_v10  ;;  %v8002_v10 = vld [vmem:[#allocation6 + $0xfd8] sm:$0xff]  }
 0x238   :  { %7340 = vmatprep.subr.bf16.mxu0 %v7965_v12  ;;  %7361 = vmatpush3.bf16.msra.mxu1 %v7964_v11  ;;  %v8003_v11 = vld [vmem:[#allocation6 + $0xf18] sm:$0xff]  }
 0x239   :  { %7362 = vmatprep.subr.bf16.mxu1 %v7966_v13  ;;  %v8004_v12 = vld [vmem:[#allocation6 + $0xf98] sm:$0xff]   ;;  %v8005_v13 = vld [vmem:[#allocation6 + $0xf60] sm:$0xff]  }
 0x23b   :  { %7341 = vmatpush3.bf16.msra.mxu0 %v7967_v14  ;;  %v8006_v14 = vld [vmem:[#allocation6 + $0xfe0] sm:$0xff]  }
 0x23c   :  { %7342 = vmatprep.subr.bf16.mxu0 %v7969_v16  ;;  %7363 = vmatpush3.bf16.msra.mxu1 %v7968_v15  ;;  %v8007_v15 = vld [vmem:[#allocation6 + $0xf20] sm:$0xff]  }
 0x23d   :  { %7364 = vmatprep.subr.bf16.mxu1 %v7970_v17  ;;  %v8008_v16 = vld [vmem:[#allocation6 + $0xfa0] sm:$0xff]   ;;  %v8009_v17 = vld [vmem:[#allocation6 + $0xf68] sm:$0xff]  }
 0x23f   :  { %7343 = vmatpush3.bf16.msra.mxu0 %v7971_v18  ;;  %v8010_v18 = vld [vmem:[#allocation6 + $0xfe8] sm:$0xff]  }
 0x240   :  { %7344 = vmatprep.subr.bf16.mxu0 %v7973_v20  ;;  %7365 = vmatpush3.bf16.msra.mxu1 %v7972_v19  ;;  %v8011_v20 = vld [vmem:[#allocation6 + $0xf28] sm:$0xff]  }
 0x241   :  { %7366 = vmatprep.subr.bf16.mxu1 %v7974_v21 }
 0x243   :  { %7345 = vmatpush3.bf16.msra.mxu0 %v7975_v22  ;;  %v8012_v22 = vld [vmem:[#allocation6 + $0xfa8] sm:$0xff]  }
 0x244   :  { %7346 = vmatprep.subr.bf16.mxu0 %v7977_v24  ;;  %7367 = vmatpush3.bf16.msra.mxu1 %v7976_v23 }
 0x245   :  { %v7044_v26 = vpop.f32.mrb[28].mxu0  ;;  %7368 = vmatprep.subr.bf16.mxu1 %v7978_v25 }
 0x246   :  { %v7045_v28 = vpop.f32.mrb[29].mxu0  ;;  %v7066_v30 = vpop.f32.mrb[28].mxu1 }
 0x247   :  { %v7046_v31 = vadd.f32 %v7045_v28, %v7044_v26  ;;  %v7047_v32 = vpop.f32.mrb[30].mxu0  ;;  %v7067_v36 = vpop.f32.mrb[29].mxu1  ;;  %7347 = vmatpush3.bf16.msra.mxu0 %v7979_v27  ;;  %v8013_v26 = vld [vmem:[#allocation6 + $0xf70] sm:$0xff]  }
 0x248   :  { %v7048_v37 = vpop.f32.mrb[31].mxu0  ;;  %v7068_v39 = vadd.f32 %v7067_v36, %v7066_v30  ;;  %v7069_v40 = vpop.f32.mrb[30].mxu1  ;;  %7348 = vmatprep.subr.bf16.mxu0 %v7981_v33  ;;  %7369 = vmatpush3.bf16.msra.mxu1 %v7980_v29  ;;  %v8014_v27 = vld [vmem:[#allocation6 + $0xff0] sm:$0xff]  }
 0x249   :  { %v5271_v38 = vadd.f32 %v7046_v31, %v8420_v61  ;;  %v7070_v42 = vpop.f32.mrb[31].mxu1  ;;  %7370 = vmatprep.subr.bf16.mxu1 %v7982_v34  ;;  %v1536_v61 = vcombine.high %v1514_v54, %v1514_v54  ;;  %v8015_v33 = vld [vmem:[#allocation6 + $0xf30] sm:$0xff]   ;;  %v8019_v40 = vld [vmem:[#allocation6 + $0xf38] sm:$0xff]  }
 0x24a   :  { %v8016_v36 = vld [vmem:[#allocation6 + $0xfb0] sm:$0xff]   ;;  %v1521_v42 = vrot.slane %v8430_v56, %v8325_v35 }
 0x24b   :  { %v8425_v44 = vadd.f32 %v7068_v39, %v5271_v38  ;;  %7349 = vmatpush3.bf16.msra.mxu0 %v7983_v41  ;;  %v8017_v38 = vld [vmem:[#allocation6 + $0xf78] sm:$0xff]  }
 0x24c   :  { %7350 = vmatprep.subr.bf16.mxu0 %v7985_v45  ;;  %7371 = vmatpush3.bf16.msra.mxu1 %v7984_v43  ;;  %v8018_v39 = vld [vmem:[#allocation6 + $0xff8] sm:$0xff]   ;;  %v1537_v43 = vcombine.high %v1521_v42, %v1521_v42 }
 0x24d   :  { %7372 = vmatprep.subr.bf16.mxu1 %v7986_v46  ;;  %v8020_v41 = vld [vmem:[#allocation6 + $0xfb8] sm:$0xff]  }
 0x24f   :  { %7351 = vmatpush3.bf16.msra.mxu0 %v7987_v47 }
 0x250   :  { %7380 = vmatprep.subr.bf16.mxu0 %v7989_v50  ;;  %7373 = vmatpush3.bf16.msra.mxu1 %v7988_v52 }
 0x251   :  { %7402 = vmatprep.subr.bf16.mxu1 %v7990_v55 }
 0x252   :  { %5829 = vmatmul.mubr.bf16.vlgmr.msra.gmra.mrb[56].mxu0 %v1514_v54 }
 0x253   :  { %7381 = vmatpush3.bf16.msra.mxu0 %v7991_v57  ;;  %5869 = vmatmul.mubr.bf16.vlgmr.msra.gmra.mrb[56].mxu1 %v1536_v61 }
 0x254   :  { %7382 = vmatprep.subr.bf16.mxu0 %v7993_v62  ;;  %7403 = vmatpush3.bf16.msra.mxu1 %v7992_v59 }
 0x255   :  { %5908 = vmatprep.mubr.bf16.mxu0 %v1535_v1  ;;  %7404 = vmatprep.subr.bf16.mxu1 %v7994_v0 }
 0x256   :  { %5948 = vmatprep.mubr.bf16.mxu1 %v1539_v4  ;;  %v8209_v4 = vmov 0.0  }
 0x257   :  { %7383 = vmatpush3.bf16.msra.mxu0 %v7995_v2  ;;  %106 = vst [vmem:[#allocation2] sm:$0x3] %v8209_v4 }
 0x258   :  { %7384 = vmatprep.subr.bf16.mxu0 %v7997_v5  ;;  %7405 = vmatpush3.bf16.msra.mxu1 %v7996_v3  ;;  %v8022_v3 = vld [vmem:[%s8492_s3] sm:$0xff]   ;;  %v8023_v5 = vld [vmem:[%s8492_s3 + $0x8] sm:$0xff]  }
 0x259   :  { %7406 = vmatprep.subr.bf16.mxu1 %v7998_v6 }
 0x25b   :  { %7385 = vmatpush3.bf16.msra.mxu0 %v7999_v7 }
 0x25c   :  { %7386 = vmatprep.subr.bf16.mxu0 %v8001_v9  ;;  %7407 = vmatpush3.bf16.msra.mxu1 %v8000_v8 }
 0x25d   :  { %7408 = vmatprep.subr.bf16.mxu1 %v8002_v10 }
 0x25f   :  { %7387 = vmatpush3.bf16.msra.mxu0 %v8003_v11 }
 0x260   :  { %7388 = vmatprep.subr.bf16.mxu0 %v8005_v13  ;;  %7409 = vmatpush3.bf16.msra.mxu1 %v8004_v12  ;;  %v8024_v13 = vld [vmem:[%s8492_s3 + $0x10] sm:$0xff]  }
 0x261   :  { %7410 = vmatprep.subr.bf16.mxu1 %v8006_v14 }
 0x263   :  { %7389 = vmatpush3.bf16.msra.mxu0 %v8007_v15 }
 0x264   :  { %7390 = vmatprep.subr.bf16.mxu0 %v8009_v17  ;;  %7411 = vmatpush3.bf16.msra.mxu1 %v8008_v16 }
 0x265   :  { %v7088_v19 = vpop.f32.mrb[32].mxu0  ;;  %7412 = vmatprep.subr.bf16.mxu1 %v8010_v18 }
 0x266   :  { %v7089_v21 = vpop.f32.mrb[33].mxu0  ;;  %v7110_v23 = vpop.f32.mrb[32].mxu1 }
 0x267   :  { %v7090_v24 = vadd.f32 %v7089_v21, %v7088_v19  ;;  %v7091_v25 = vpop.f32.mrb[34].mxu0  ;;  %v7111_v28 = vpop.f32.mrb[33].mxu1  ;;  %7391 = vmatpush3.bf16.msra.mxu0 %v8011_v20  ;;  %v8025_v19 = vld [vmem:[%s8492_s3 + $0x18] sm:$0xff]   ;;  %v8026_v20 = vld [vmem:[%s8492_s3 + $0x20] sm:$0xff]   ;;  %v8027_v21 = vld [vmem:[%s8492_s3 + $0x28] sm:$0xff]  }
 0x268   :  { %v7092_v29 = vpop.f32.mrb[35].mxu0  ;;  %v7112_v31 = vadd.f32 %v7111_v28, %v7110_v23  ;;  %v7113_v32 = vpop.f32.mrb[34].mxu1  ;;  %7392 = vmatprep.subr.bf16.mxu0 %v8013_v26  ;;  %7413 = vmatpush3.bf16.msra.mxu1 %v8012_v22  ;;  %v8028_v22 = vld [vmem:[%s8492_s3 + $0x30] sm:$0xff]   ;;  %v8029_v23 = vld [vmem:[%s8492_s3 + $0x38] sm:$0xff]   ;;  %s8212_s3 = smov [#allocation14]  }
 0x269   :  { %v5351_v30 = vadd.f32 %v7090_v24, %v8425_v44  ;;  %v7114_v34 = vpop.f32.mrb[35].mxu1  ;;  %7414 = vmatprep.subr.bf16.mxu1 %v8014_v27  ;;  %s6184_s15 = sshll.u32 %s8212_s3, 4  ;;  %s6185_s15 = int_to_ptr.vmem [resolvable:$true] %s6184_s15 }
 0x26a   :  { %s8166_s16 = scalar_lea.vmem %s6185_s15, 32  ;;  %p8171_p7 = scmp.lt.s32.totalorder %s6185_s15, %s6185_s15 }
 0x26b   :  { %v5391_v37 = vadd.f32 %v7112_v31, %v5351_v30  ;;  %7393 = vmatpush3.bf16.msra.mxu0 %v8015_v33  ;;  %p8167_p6 = scmp.ne.s32.totalorder %s6185_s15, %s8166_s16  ;;  %p8172_p8 = scmp.lt.s32.totalorder %s8166_s16, %s8166_s16 }
 0x26c   :  { %7394 = vmatprep.subr.bf16.mxu0 %v8017_v38  ;;  %7415 = vmatpush3.bf16.msra.mxu1 %v8016_v36 }
 0x26d   :  { %7416 = vmatprep.subr.bf16.mxu1 %v8018_v39  ;;  %p8173_p9 = por %p8172_p8, %p8171_p7 }
 0x26f   :  { %7395 = vmatpush3.bf16.msra.mxu0 %v8019_v40  ;;  %p8174_p10 = pnand %p8173_p9, %p8167_p6 }
 0x270   :  { %7417 = vmatpush3.bf16.msra.mxu1 %v8020_v41  ;;  %7441 = vmatprep.subr.bf16.mxu0 %v8209_v4 }
 0x272   :  { %5909 = vmatmul.mubr.bf16.vlgmr.msra.gmra.mrb[60].mxu0 %v1521_v42 }
 0x273   :  { %5949 = vmatmul.mubr.bf16.vlgmr.msra.gmra.mrb[60].mxu1 %v1537_v43  ;;  %7442 = vmatpush3.bf16.msra.mxu0 %v8022_v3 }
 0x274   :  { %7443 = vmatprep.subr.bf16.mxu0 %v8209_v4  ;;  %7457 = vmatprep.mubr.msk.bf16.mxu0 %vm8210_vm0, %v8209_v4 }
 0x275   :  { %7475 = vmatprep.mubr.msk.f32.mxu1 %vm8210_vm0, %v8209_v4 }
 0x277   :  { %7444 = vmatpush3.bf16.msra.mxu0 %v8023_v5 }
 0x278   :  { %7445 = vmatprep.subr.bf16.mxu0 %v8209_v4 }
 0x27b   :  { %7446 = vmatpush3.bf16.msra.mxu0 %v8024_v13 }
 0x27c   :  { %7447 = vmatprep.subr.bf16.mxu0 %v8209_v4 }
 0x27f   :  { %7448 = vmatpush3.bf16.msra.mxu0 %v8025_v19 }
 0x280   :  { %7449 = vmatprep.subr.bf16.mxu0 %v8209_v4 }
 0x283   :  { %7450 = vmatpush3.bf16.msra.mxu0 %v8026_v20 }
 0x284   :  { %7451 = vmatprep.subr.bf16.mxu0 %v8209_v4 }
 0x285   :  { %v7132_v44 = vpop.f32.mrb[36].mxu0 }
 0x286   :  { %v7133_v45 = vpop.f32.mrb[37].mxu0  ;;  %v7154_v46 = vpop.f32.mrb[36].mxu1 }
 0x287   :  { %v7134_v47 = vadd.f32 %v7133_v45, %v7132_v44  ;;  %v7135_v48 = vpop.f32.mrb[38].mxu0  ;;  %v7155_v49 = vpop.f32.mrb[37].mxu1  ;;  %7452 = vmatpush3.bf16.msra.mxu0 %v8027_v21 }
 0x288   :  { %v7136_v50 = vpop.f32.mrb[39].mxu0  ;;  %v7156_v52 = vadd.f32 %v7155_v49, %v7154_v46  ;;  %v7157_v53 = vpop.f32.mrb[38].mxu1  ;;  %7453 = vmatprep.subr.bf16.mxu0 %v8209_v4 }
 0x289   :  { %v5431_v51 = vadd.f32 %v7134_v47, %v5391_v37  ;;  %v7158_v54 = vpop.f32.mrb[39].mxu1 }
 0x28b   :  { %v5471_v55 = vadd.f32 %v7156_v52, %v5431_v51  ;;  %7454 = vmatpush3.bf16.msra.mxu0 %v8028_v22 }
 0x28c   :  { %7455 = vmatprep.subr.bf16.mxu0 %v8209_v4 }
 0x28f   :  { %7456 = vmatpush3.bf16.msra.mxu0 %v8029_v23  ;;  %v6090_v23 = vld [vmem:[#allocation11] sm:$0xff] }
 0x2a5   :  { %v7176_v35 = vpop.f32.mrb[40].mxu0 }
 0x2a6   :  { %v7177_v56 = vpop.f32.mrb[41].mxu0  ;;  %v7198_v57 = vpop.f32.mrb[40].mxu1 }
 0x2a7   :  { %v7178_v58 = vadd.f32 %v7177_v56, %v7176_v35  ;;  %v7179_v59 = vpop.f32.mrb[42].mxu0  ;;  %v7199_v60 = vpop.f32.mrb[41].mxu1 }
 0x2a8   :  { %v7180_v61 = vpop.f32.mrb[43].mxu0  ;;  %v7200_v63 = vadd.f32 %v7199_v60, %v7198_v57  ;;  %v7201_v0 = vpop.f32.mrb[42].mxu1 }
 0x2a9   :  { %v5511_v62 = vadd.f32 %v7178_v58, %v5471_v55  ;;  %v7202_v1 = vpop.f32.mrb[43].mxu1 }
 0x2ab   :  { %v5551_v2 = vadd.f32 %v7200_v63, %v5511_v62 }
 0x2c5   :  { %v7220_v6 = vpop.f32.mrb[44].mxu0 }
 0x2c6   :  { %v7221_v7 = vpop.f32.mrb[45].mxu0  ;;  %v7242_v8 = vpop.f32.mrb[44].mxu1 }
 0x2c7   :  { %v7222_v9 = vadd.f32 %v7221_v7, %v7220_v6  ;;  %v7223_v10 = vpop.f32.mrb[46].mxu0  ;;  %v7243_v11 = vpop.f32.mrb[45].mxu1  ;;  %v107_v7 = vld [vmem:[#allocation2] sm:$0x3] }
 0x2c8   :  { %v7224_v12 = vpop.f32.mrb[47].mxu0  ;;  %v7244_v15 = vadd.f32 %v7243_v11, %v7242_v8  ;;  %v7245_v16 = vpop.f32.mrb[46].mxu1  ;;  %v6708_v11 = vld [vmem:[#allocation8] ss:$0 sm:$0xff] }
 0x2c9   :  { %v5591_v14 = vadd.f32 %v7222_v9, %v5551_v2  ;;  %v7246_v17 = vpop.f32.mrb[47].mxu1  ;;  %v6709_v16 = vld [vmem:[#allocation9] ss:$0 sm:$0xff] }
 0x2cb   :  { %v5631_v18 = vadd.f32 %v7244_v15, %v5591_v14 }
 0x2e5   :  { %v7264_v24 = vpop.f32.mrb[48].mxu0 }
 0x2e6   :  { %v7265_v25 = vpop.f32.mrb[49].mxu0  ;;  %v7286_v26 = vpop.f32.mrb[48].mxu1 }
 0x2e7   :  { %v7266_v27 = vadd.f32 %v7265_v25, %v7264_v24  ;;  %v7267_v28 = vpop.f32.mrb[50].mxu0  ;;  %v7287_v29 = vpop.f32.mrb[49].mxu1  ;;  %v6091_v24 = vld [vmem:[#allocation11 + $0x8] sm:$0xff] }
 0x2e8   :  { %v7268_v30 = vpop.f32.mrb[51].mxu0  ;;  %v7288_v32 = vadd.f32 %v7287_v29, %v7286_v26  ;;  %v7289_v33 = vpop.f32.mrb[50].mxu1  ;;  %v7479_v25 = vpack.c.bf16 %v6091_v24, %v6090_v23  ;;  %v8211_v26 = vmov 0.0|0.0   ;;  %v6093_v28 = vld [vmem:[#allocation11 + $0x18] sm:$0xff] }
 0x2e9   :  { %v5671_v31 = vadd.f32 %v7266_v27, %v5631_v18  ;;  %v7290_v34 = vpop.f32.mrb[51].mxu1  ;;  %7478 = vmatprep.subr.bf16.mxu1 %v8211_v26  ;;  %v6092_v27 = vld [vmem:[#allocation11 + $0x10] sm:$0xff]  ;;  %v6094_v30 = vld [vmem:[#allocation11 + $0x20] sm:$0xff] }
 0x2ea   :  { %7480 = vmatpush3.bf16.msra.mxu1 %v7479_v25  ;;  %v7482_v29 = vpack.c.bf16 %v6093_v28, %v6092_v27  ;;  %v6096_v33 = vld [vmem:[#allocation11 + $0x30] sm:$0x3] }
 0x2eb   :  { %v5711_v36 = vadd.f32 %v7288_v32, %v5671_v31  ;;  %7481 = vmatprep.subr.bf16.mxu1 %v8211_v26  ;;  %v6095_v31 = vld [vmem:[#allocation11 + $0x28] sm:$0xff] }
 0x2ec   :  { %v7485_v32 = vpack.c.bf16 %v6095_v31, %v6094_v30 }
 0x2ee   :  { %7483 = vmatpush3.bf16.msra.mxu1 %v7482_v29 }
 0x2ef   :  { %7484 = vmatprep.subr.bf16.mxu1 %v8211_v26 }
 0x2f2   :  { %7486 = vmatpush3.bf16.msra.mxu1 %v7485_v32 }
 0x2f3   :  { %7473 = vmatprep.subr.mxu1 %v8209_v4 }
 0x2f6   :  { %7474 = vmatpush3.msk.msra.mxu1 %vm6101_vm2, %v6096_v33 }
 0x305   :  { %v7308_v37 = vpop.f32.mrb[52].mxu0 }
 0x306   :  { %v7309_v38 = vpop.f32.mrb[53].mxu0  ;;  %v7330_v39 = vpop.f32.mrb[52].mxu1 }
 0x307   :  { %v7310_v40 = vadd.f32 %v7309_v38, %v7308_v37  ;;  %v7311_v41 = vpop.f32.mrb[54].mxu0  ;;  %v7331_v42 = vpop.f32.mrb[53].mxu1 }
 0x308   :  { %v7312_v43 = vpop.f32.mrb[55].mxu0  ;;  %v7332_v45 = vadd.f32 %v7331_v42, %v7330_v39  ;;  %v7333_v46 = vpop.f32.mrb[54].mxu1 }
 0x309   :  { %v5751_v44 = vadd.f32 %v7310_v40, %v5711_v36  ;;  %v7334_v47 = vpop.f32.mrb[55].mxu1 }
 0x30b   :  { %v5791_v48 = vadd.f32 %v7332_v45, %v5751_v44 }
 0x325   :  { %v7352_v49 = vpop.f32.mrb[56].mxu0 }
 0x326   :  { %v7353_v50 = vpop.f32.mrb[57].mxu0  ;;  %v7374_v51 = vpop.f32.mrb[56].mxu1 }
 0x327   :  { %v7354_v52 = vadd.f32 %v7353_v50, %v7352_v49  ;;  %v7355_v53 = vpop.f32.mrb[58].mxu0  ;;  %v7375_v54 = vpop.f32.mrb[57].mxu1 }
 0x328   :  { %v7356_v55 = vpop.f32.mrb[59].mxu0  ;;  %v7376_v56 = vadd.f32 %v7375_v54, %v7374_v51  ;;  %v7377_v57 = vpop.f32.mrb[58].mxu1 }
 0x329   :  { %v5831_v35 = vadd.f32 %v7354_v52, %v5791_v48  ;;  %v7378_v58 = vpop.f32.mrb[59].mxu1 }
 0x32b   :  { %v5871_v59 = vadd.f32 %v7376_v56, %v5831_v35 }
 0x345   :  { %v7396_v60 = vpop.f32.mrb[60].mxu0 }
 0x346   :  { %v7397_v61 = vpop.f32.mrb[61].mxu0  ;;  %v7418_v62 = vpop.f32.mrb[60].mxu1 }
 0x347   :  { %v7398_v63 = vadd.f32 %v7397_v61, %v7396_v60  ;;  %v7399_v0 = vpop.f32.mrb[62].mxu0  ;;  %v7419_v1 = vpop.f32.mrb[61].mxu1 }
 0x348   :  { %v7400_v2 = vpop.f32.mrb[63].mxu0  ;;  %v7420_v5 = vadd.f32 %v7419_v1, %v7418_v62  ;;  %v7421_v6 = vpop.f32.mrb[62].mxu1 }
 0x349   :  { %v5911_v3 = vadd.f32 %v7398_v63, %v5871_v59  ;;  %v7422_v8 = vpop.f32.mrb[63].mxu1 }
 0x34b   :  { %v5951_v9 = vadd.f32 %v7420_v5, %v5911_v3 }
 0x34d   :  { %v5956_v10 = vadd.f32 %v5951_v9, %v107_v7 }
 0x34f   :  { %5957 = vst [vmem:[#allocation2] sm:$0x3] %v5956_v10 }
 0x356   :  { %v5961_v12 = vld [vmem:[#allocation2] sm:$0x3] }
 0x357   :  { %v5969_v13 = vadd.f32 %v6708_v11, %v5961_v12 }
 0x359   :  { %v5970_v14 = vmax.f32 %v5969_v13, 0.0 }
 0x35b   :  { %v5971_v15 = vpack.c.bf16 %v5970_v14, %v5970_v14 }
 0x35d   :  { %7458 = vmatmul.mubr.bf16.vlgmr.msra.gmra.mrb[64].mxu0 %v5971_v15 }
 0x430   :  { %v6077_v17 = vpop.f32.mrb[64].mxu0 }
 0x431   :  { %v6078_v18 = vadd.f32 %v6709_v16, %v6077_v17  ;;  %v7459_v19 = vpop.f32.mrb[65].mxu0 }
 0x432   :  { %v6080_v20 = vpop.f32.mrb[66].mxu0 }
 0x433   :  { %v7460_v21 = vpop.f32.mrb[67].mxu0  ;;  %v6084_v22 = vsel %vm6083_vm1, %v6078_v18, -inf }
 0x434   :  { %6085 = vmax.xlane.f32.xlu0 %v6084_v22 }
 0x4c1   :  { %v6086_v34 = vpop.xlane.xlu0 %6085 }
 0x4c2   :  { %v6087_v36 = vsub.f32 %v6078_v18, %v6086_v34 }
 0x4c4   :  { %v6088_v37 = vmul.f32 1.442695, %v6087_v36 }
 0x4c6   :  { %8030 = vpow2.f32 %v6088_v37 }
 0x4d0   :  { %v8031_v38 = vpop.eup %8030 }
 0x4d1   :  { %7476 = vmatmul.mubr.msk.f32.vlgmr.msra.gmra.mrb[64].mxu1 %vm6097_vm3, %v8031_v38 }
 0x5a4   :  { %v6171_v39 = vpop.f32.mrb[64].mxu1 }
 0x5a5   :  { %8032 = vrcp.f32 %v6171_v39  ;;  %v7477_v40 = vpop.f32.mrb[65].mxu1 }
 0x5af   :  { %v8033_v41 = vpop.eup %8032 }
 0x5b0   :  { %v6176_v42 = vmul.f32 %v8033_v41, %v8031_v38 }
 0x5b2   :  { %6177 = vst.msk [vmem:[#allocation14] sm:$0x3] %vm6083_vm1, %v6176_v42 }
 0x5b3   :  { %8177 = shalt.err (!%p8174_p10)
}
 0x5b4   :  { %s8178_s21 = scalar_lea.hbm %s8496_s7, 32 }
 0x5b5   :  { %p8179_p11 = scmp.ne.s32.totalorder %s8496_s7, %s8178_s21  ;;  %p8182_p12 = scmp.lt.u32.totalorder %s8178_s21, %s8496_s7 }
 0x5b7   :  { %p8184_p13 = pnand %p8182_p12, %p8179_p11 }
 0x5b9   :  { %8187 = shalt.err (!%p8184_p13)
}
 0x5ba   :  { %6187 = dma.vmem_to_hbm [thread:$0]  %s6185_s15, 32, %s8496_s7, [#allocation5]  }
 0x5bb   :  { %8196 = dma.done.wait [#allocation5], 32  }
 0x5bc   :  { %8197 = vsyncadd [#allocation5], 4294967264 }
 0x5bd   :  { %6191 = vsyncpa [#allocation4], 1 }
 0x5be   :  { %6192 = vsyncpa [#allocation7], 1 }
 0x5bf   :  { %6193 = vsyncpa [#allocation10], 1 }
 0x5c0   :  { %6194 = vsyncpa [#allocation13], 1 }
 0x5c1   :  { %6195 = vsyncpa [#allocation5], 1 }

</bundles_post_ra>
